<compile_context>
chip_gen: v5e
topology: v5e:2x2
jax: 0.10.0
libtpu: 0.0.40
codegen_flags: <defaults>
</compile_context>

<pallas_src>
import jax
import jax.numpy as jnp
from jax import lax
from jax.experimental import pallas as pl
from jax.experimental.pallas import tpu as pltpu

STATE_DIM = 11     # Hopper observation dim
ACTION_DIM = 3     # Hopper action dim
HIDDEN_DIM = 32    # small hidden size for this synthetic test
N_EULER_STEPS = 16
BATCH = 8


def _state_predictor_kernel(state_ref, action_ref,
                            w1s_ref, w1a_ref, b1_ref,
                            w2_ref, b2_ref,
                            w3_ref, b3_ref,
                            w4_ref, b4_ref,
                            out_ref):
    # ---- hoisted loads (loop-invariant; keep them off the scf.for body) ----
    w1s = w1s_ref[...]
    w2 = w2_ref[...]
    b2 = b2_ref[...]
    w3 = w3_ref[...]
    b3 = b3_ref[...]

    # Fold the Euler step size into the output layer once (inside the kernel,
    # not in the wrapper), removing a per-step VPU multiply on the serial chain.
    step_size = jnp.float32(1.0 / N_EULER_STEPS)
    w4s = w4_ref[...] * step_size
    b4s = b4_ref[...] * step_size

    # Action contribution to the layer-1 preactivation (+ bias) is constant
    # across Euler steps: cat([s, a]) @ W1 + b1 == s @ W1s + (a @ W1a + b1).
    ap_b1 = jnp.dot(action_ref[...], w1a_ref[...],
                    preferred_element_type=jnp.float32) + b1_ref[...]

    state0 = state_ref[...]

    def euler_body(_, next_state):
        h = jnp.tanh(jnp.dot(next_state, w1s,
                             preferred_element_type=jnp.float32) + ap_b1)
        h = jnp.tanh(jnp.dot(h, w2,
                             preferred_element_type=jnp.float32) + b2)
        h = jnp.tanh(jnp.dot(h, w3,
                             preferred_element_type=jnp.float32) + b3)
        # output layer (step size pre-folded into w4s / b4s)
        return next_state + (jnp.dot(h, w4s,
                                     preferred_element_type=jnp.float32) + b4s)

    # Fixed 16 iterations, tiny body -> unroll so the scheduler can overlap
    # MXU pushes / EUP tanh across steps.
    out_ref[...] = lax.fori_loop(0, N_EULER_STEPS, euler_body, state0,
                                 unroll=True)


def state_predictor_forward(state, action, params):
    """Pallas wrapper.  state: (B, state_dim), action: (B, action_dim)."""
    (w1s, w1a, b1, w2, b2, w3, b3, w4, b4) = params
    B = state.shape[0]
    vmem = pl.BlockSpec(memory_space=pltpu.MemorySpace.VMEM)
    return pl.pallas_call(
        _state_predictor_kernel,
        out_shape=jax.ShapeDtypeStruct((B, STATE_DIM), jnp.float32),
        in_specs=[vmem] * 11,
        out_specs=vmem,
    )(state, action, w1s, w1a, b1, w2, b2, w3, b3, w4, b4)


def init_params(key):
    """Deterministic init matching nn.Linear shapes (weights as (in, out))."""
    def linear(key, fan_in, fan_out):
        kw, kb = jax.random.split(key)
        bound = 1.0 / jnp.sqrt(jnp.float32(fan_in))
        w = jax.random.uniform(kw, (fan_in, fan_out), jnp.float32, -bound, bound)
        b = jax.random.uniform(kb, (1, fan_out), jnp.float32, -bound, bound)
        return w, b

    k1, k2, k3, k4 = jax.random.split(key, 4)
    in_dim = STATE_DIM + ACTION_DIM
    w1, b1 = linear(k1, in_dim, HIDDEN_DIM)
    w2, b2 = linear(k2, HIDDEN_DIM, HIDDEN_DIM)
    w3, b3 = linear(k3, HIDDEN_DIM, HIDDEN_DIM)
    w4, b4 = linear(k4, HIDDEN_DIM, STATE_DIM)
    # Split layer-1 weight into state rows and action rows (replaces torch.cat).
    w1s = w1[:STATE_DIM, :]
    w1a = w1[STATE_DIM:, :]
    return (w1s, w1a, b1, w2, b2, w3, b3, w4, b4)


def state_predictor_ref(state, action, params):
    """Pure-JAX reference of the PyTorch forward (for verification)."""
    (w1s, w1a, b1, w2, b2, w3, b3, w4, b4) = params
    w1 = jnp.concatenate([w1s, w1a], axis=0)
    next_state = state
    state_action = jnp.concatenate([state, action], axis=-1)
    step = 1.0 / N_EULER_STEPS
    for _ in range(N_EULER_STEPS):
        h = jnp.tanh(state_action @ w1 + b1)
        h = jnp.tanh(h @ w2 + b2)
        h = jnp.tanh(h @ w3 + b3)
        delta = h @ w4 + b4
        next_state = step * delta + next_state
        state_action = jnp.concatenate([next_state, action], axis=-1)
    return next_state


if __name__ == "__main__":
    key = jax.random.PRNGKey(0)
    k_params, k_state, k_action = jax.random.split(key, 3)

    params = init_params(k_params)
    state = jax.random.normal(k_state, (BATCH, STATE_DIM), jnp.float32)
    action = jax.random.normal(k_action, (BATCH, ACTION_DIM), jnp.float32)

    out = state_predictor_forward(state, action, params)
    out = jax.block_until_ready(out)

    ref = state_predictor_ref(state, action, params)
    assert out.shape == (BATCH, STATE_DIM)
    assert jnp.allclose(out, ref, atol=1e-4, rtol=1e-4)

    print("KERNEL_OK")
</pallas_src>

<mosaic_0001>
module attributes {stable_mosaic.version = 11 : i64} {
  func.func @_state_predictor_kernel(%arg0: memref<8x11xf32, #tpu.memory_space<vmem>>, %arg1: memref<8x3xf32, #tpu.memory_space<vmem>>, %arg2: memref<11x32xf32, #tpu.memory_space<vmem>>, %arg3: memref<3x32xf32, #tpu.memory_space<vmem>>, %arg4: memref<1x32xf32, #tpu.memory_space<vmem>>, %arg5: memref<32x32xf32, #tpu.memory_space<vmem>>, %arg6: memref<1x32xf32, #tpu.memory_space<vmem>>, %arg7: memref<32x32xf32, #tpu.memory_space<vmem>>, %arg8: memref<1x32xf32, #tpu.memory_space<vmem>>, %arg9: memref<32x11xf32, #tpu.memory_space<vmem>>, %arg10: memref<1x11xf32, #tpu.memory_space<vmem>>, %arg11: memref<8x11xf32, #tpu.memory_space<vmem>>) attributes {dimension_semantics = [], scalar_prefetch = 0 : i64, scratch_operands = 0 : i64, tpu.core_type = #tpu.core_type<tc>} {
    %c0 = arith.constant 0 : index
    %c0_0 = arith.constant 0 : index
    %0 = vector.load %arg2[%c0, %c0_0] : memref<11x32xf32, #tpu.memory_space<vmem>>, vector<11x32xf32>
    %c0_1 = arith.constant 0 : index
    %c0_2 = arith.constant 0 : index
    %1 = vector.load %arg5[%c0_1, %c0_2] : memref<32x32xf32, #tpu.memory_space<vmem>>, vector<32x32xf32>
    %c0_3 = arith.constant 0 : index
    %c0_4 = arith.constant 0 : index
    %2 = vector.load %arg6[%c0_3, %c0_4] : memref<1x32xf32, #tpu.memory_space<vmem>>, vector<1x32xf32>
    %c0_5 = arith.constant 0 : index
    %c0_6 = arith.constant 0 : index
    %3 = vector.load %arg7[%c0_5, %c0_6] : memref<32x32xf32, #tpu.memory_space<vmem>>, vector<32x32xf32>
    %c0_7 = arith.constant 0 : index
    %c0_8 = arith.constant 0 : index
    %4 = vector.load %arg8[%c0_7, %c0_8] : memref<1x32xf32, #tpu.memory_space<vmem>>, vector<1x32xf32>
    %c0_9 = arith.constant 0 : index
    %c0_10 = arith.constant 0 : index
    %5 = vector.load %arg9[%c0_9, %c0_10] : memref<32x11xf32, #tpu.memory_space<vmem>>, vector<32x11xf32>
    %cst = arith.constant 6.250000e-02 : f32
    %6 = vector.broadcast %cst : f32 to vector<32x11xf32>
    %7 = arith.mulf %5, %6 : vector<32x11xf32>
    %c0_11 = arith.constant 0 : index
    %c0_12 = arith.constant 0 : index
    %8 = vector.load %arg10[%c0_11, %c0_12] : memref<1x11xf32, #tpu.memory_space<vmem>>, vector<1x11xf32>
    %cst_13 = arith.constant 6.250000e-02 : f32
    %9 = vector.broadcast %cst_13 : f32 to vector<1x11xf32>
    %10 = arith.mulf %8, %9 : vector<1x11xf32>
    %c0_14 = arith.constant 0 : index
    %c0_15 = arith.constant 0 : index
    %11 = vector.load %arg1[%c0_14, %c0_15] : memref<8x3xf32, #tpu.memory_space<vmem>>, vector<8x3xf32>
    %c0_16 = arith.constant 0 : index
    %c0_17 = arith.constant 0 : index
    %12 = vector.load %arg3[%c0_16, %c0_17] : memref<3x32xf32, #tpu.memory_space<vmem>>, vector<3x32xf32>
    %cst_18 = arith.constant dense<0.000000e+00> : vector<8x32xf32>
    %13 = tpu.matmul %11, %12, %cst_18 {dimension_numbers = #tpu.dot_dimension_numbers<[1], [0], [0], [1], [0, 0, 1, 1], [], []>} : vector<8x3xf32>, vector<3x32xf32>, vector<8x32xf32> -> vector<8x32xf32>
    %c0_19 = arith.constant 0 : index
    %c0_20 = arith.constant 0 : index
    %14 = vector.load %arg4[%c0_19, %c0_20] : memref<1x32xf32, #tpu.memory_space<vmem>>, vector<1x32xf32>
    %15 = vector.broadcast %14 : vector<1x32xf32> to vector<8x32xf32>
    %16 = arith.addf %13, %15 : vector<8x32xf32>
    %c0_21 = arith.constant 0 : index
    %c0_22 = arith.constant 0 : index
    %17 = vector.load %arg0[%c0_21, %c0_22] : memref<8x11xf32, #tpu.memory_space<vmem>>, vector<8x11xf32>
    %c0_i32 = arith.constant 0 : i32
    %cst_23 = arith.constant dense<0.000000e+00> : vector<8x32xf32>
    %18 = tpu.matmul %17, %0, %cst_23 {dimension_numbers = #tpu.dot_dimension_numbers<[1], [0], [0], [1], [0, 0, 1, 1], [], []>} : vector<8x11xf32>, vector<11x32xf32>, vector<8x32xf32> -> vector<8x32xf32>
    %19 = arith.addf %18, %16 : vector<8x32xf32>
    %20 = math.tanh %19 : vector<8x32xf32>
    %cst_24 = arith.constant dense<0.000000e+00> : vector<8x32xf32>
    %21 = tpu.matmul %20, %1, %cst_24 {dimension_numbers = #tpu.dot_dimension_numbers<[1], [0], [0], [1], [0, 0, 1, 1], [], []>} : vector<8x32xf32>, vector<32x32xf32>, vector<8x32xf32> -> vector<8x32xf32>
    %22 = vector.broadcast %2 : vector<1x32xf32> to vector<8x32xf32>
    %23 = arith.addf %21, %22 : vector<8x32xf32>
    %24 = math.tanh %23 : vector<8x32xf32>
    %cst_25 = arith.constant dense<0.000000e+00> : vector<8x32xf32>
    %25 = tpu.matmul %24, %3, %cst_25 {dimension_numbers = #tpu.dot_dimension_numbers<[1], [0], [0], [1], [0, 0, 1, 1], [], []>} : vector<8x32xf32>, vector<32x32xf32>, vector<8x32xf32> -> vector<8x32xf32>
    %26 = vector.broadcast %4 : vector<1x32xf32> to vector<8x32xf32>
    %27 = arith.addf %25, %26 : vector<8x32xf32>
    %28 = math.tanh %27 : vector<8x32xf32>
    %cst_26 = arith.constant dense<0.000000e+00> : vector<8x11xf32>
    %29 = tpu.matmul %28, %7, %cst_26 {dimension_numbers = #tpu.dot_dimension_numbers<[1], [0], [0], [1], [0, 0, 1, 1], [], []>} : vector<8x32xf32>, vector<32x11xf32>, vector<8x11xf32> -> vector<8x11xf32>
    %30 = vector.broadcast %10 : vector<1x11xf32> to vector<8x11xf32>
    %31 = arith.addf %29, %30 : vector<8x11xf32>
    %32 = arith.addf %17, %31 : vector<8x11xf32>
    %c1_i32 = arith.constant 1 : i32
    %cst_27 = arith.constant dense<0.000000e+00> : vector<8x32xf32>
    %33 = tpu.matmul %32, %0, %cst_27 {dimension_numbers = #tpu.dot_dimension_numbers<[1], [0], [0], [1], [0, 0, 1, 1], [], []>} : vector<8x11xf32>, vector<11x32xf32>, vector<8x32xf32> -> vector<8x32xf32>
    %34 = arith.addf %33, %16 : vector<8x32xf32>
    %35 = math.tanh %34 : vector<8x32xf32>
    %cst_28 = arith.constant dense<0.000000e+00> : vector<8x32xf32>
    %36 = tpu.matmul %35, %1, %cst_28 {dimension_numbers = #tpu.dot_dimension_numbers<[1], [0], [0], [1], [0, 0, 1, 1], [], []>} : vector<8x32xf32>, vector<32x32xf32>, vector<8x32xf32> -> vector<8x32xf32>
    %37 = vector.broadcast %2 : vector<1x32xf32> to vector<8x32xf32>
    %38 = arith.addf %36, %37 : vector<8x32xf32>
    %39 = math.tanh %38 : vector<8x32xf32>
    %cst_29 = arith.constant dense<0.000000e+00> : vector<8x32xf32>
    %40 = tpu.matmul %39, %3, %cst_29 {dimension_numbers = #tpu.dot_dimension_numbers<[1], [0], [0], [1], [0, 0, 1, 1], [], []>} : vector<8x32xf32>, vector<32x32xf32>, vector<8x32xf32> -> vector<8x32xf32>
    %41 = vector.broadcast %4 : vector<1x32xf32> to vector<8x32xf32>
    %42 = arith.addf %40, %41 : vector<8x32xf32>
    %43 = math.tanh %42 : vector<8x32xf32>
    %cst_30 = arith.constant dense<0.000000e+00> : vector<8x11xf32>
    %44 = tpu.matmul %43, %7, %cst_30 {dimension_numbers = #tpu.dot_dimension_numbers<[1], [0], [0], [1], [0, 0, 1, 1], [], []>} : vector<8x32xf32>, vector<32x11xf32>, vector<8x11xf32> -> vector<8x11xf32>
    %45 = vector.broadcast %10 : vector<1x11xf32> to vector<8x11xf32>
    %46 = arith.addf %44, %45 : vector<8x11xf32>
    %47 = arith.addf %32, %46 : vector<8x11xf32>
    %c2_i32 = arith.constant 2 : i32
    %cst_31 = arith.constant dense<0.000000e+00> : vector<8x32xf32>
    %48 = tpu.matmul %47, %0, %cst_31 {dimension_numbers = #tpu.dot_dimension_numbers<[1], [0], [0], [1], [0, 0, 1, 1], [], []>} : vector<8x11xf32>, vector<11x32xf32>, vector<8x32xf32> -> vector<8x32xf32>
    %49 = arith.addf %48, %16 : vector<8x32xf32>
    %50 = math.tanh %49 : vector<8x32xf32>
    %cst_32 = arith.constant dense<0.000000e+00> : vector<8x32xf32>
    %51 = tpu.matmul %50, %1, %cst_32 {dimension_numbers = #tpu.dot_dimension_numbers<[1], [0], [0], [1], [0, 0, 1, 1], [], []>} : vector<8x32xf32>, vector<32x32xf32>, vector<8x32xf32> -> vector<8x32xf32>
    %52 = vector.broadcast %2 : vector<1x32xf32> to vector<8x32xf32>
    %53 = arith.addf %51, %52 : vector<8x32xf32>
    %54 = math.tanh %53 : vector<8x32xf32>
    %cst_33 = arith.constant dense<0.000000e+00> : vector<8x32xf32>
    %55 = tpu.matmul %54, %3, %cst_33 {dimension_numbers = #tpu.dot_dimension_numbers<[1], [0], [0], [1], [0, 0, 1, 1], [], []>} : vector<8x32xf32>, vector<32x32xf32>, vector<8x32xf32> -> vector<8x32xf32>
    %56 = vector.broadcast %4 : vector<1x32xf32> to vector<8x32xf32>
    %57 = arith.addf %55, %56 : vector<8x32xf32>
    %58 = math.tanh %57 : vector<8x32xf32>
    %cst_34 = arith.constant dense<0.000000e+00> : vector<8x11xf32>
    %59 = tpu.matmul %58, %7, %cst_34 {dimension_numbers = #tpu.dot_dimension_numbers<[1], [0], [0], [1], [0, 0, 1, 1], [], []>} : vector<8x32xf32>, vector<32x11xf32>, vector<8x11xf32> -> vector<8x11xf32>
    %60 = vector.broadcast %10 : vector<1x11xf32> to vector<8x11xf32>
    %61 = arith.addf %59, %60 : vector<8x11xf32>
    %62 = arith.addf %47, %61 : vector<8x11xf32>
    %c3_i32 = arith.constant 3 : i32
    %cst_35 = arith.constant dense<0.000000e+00> : vector<8x32xf32>
    %63 = tpu.matmul %62, %0, %cst_35 {dimension_numbers = #tpu.dot_dimension_numbers<[1], [0], [0], [1], [0, 0, 1, 1], [], []>} : vector<8x11xf32>, vector<11x32xf32>, vector<8x32xf32> -> vector<8x32xf32>
    %64 = arith.addf %63, %16 : vector<8x32xf32>
    %65 = math.tanh %64 : vector<8x32xf32>
    %cst_36 = arith.constant dense<0.000000e+00> : vector<8x32xf32>
    %66 = tpu.matmul %65, %1, %cst_36 {dimension_numbers = #tpu.dot_dimension_numbers<[1], [0], [0], [1], [0, 0, 1, 1], [], []>} : vector<8x32xf32>, vector<32x32xf32>, vector<8x32xf32> -> vector<8x32xf32>
    %67 = vector.broadcast %2 : vector<1x32xf32> to vector<8x32xf32>
    %68 = arith.addf %66, %67 : vector<8x32xf32>
    %69 = math.tanh %68 : vector<8x32xf32>
    %cst_37 = arith.constant dense<0.000000e+00> : vector<8x32xf32>
    %70 = tpu.matmul %69, %3, %cst_37 {dimension_numbers = #tpu.dot_dimension_numbers<[1], [0], [0], [1], [0, 0, 1, 1], [], []>} : vector<8x32xf32>, vector<32x32xf32>, vector<8x32xf32> -> vector<8x32xf32>
    %71 = vector.broadcast %4 : vector<1x32xf32> to vector<8x32xf32>
    %72 = arith.addf %70, %71 : vector<8x32xf32>
    %73 = math.tanh %72 : vector<8x32xf32>
    %cst_38 = arith.constant dense<0.000000e+00> : vector<8x11xf32>
    %74 = tpu.matmul %73, %7, %cst_38 {dimension_numbers = #tpu.dot_dimension_numbers<[1], [0], [0], [1], [0, 0, 1, 1], [], []>} : vector<8x32xf32>, vector<32x11xf32>, vector<8x11xf32> -> vector<8x11xf32>
    %75 = vector.broadcast %10 : vector<1x11xf32> to vector<8x11xf32>
    %76 = arith.addf %74, %75 : vector<8x11xf32>
    %77 = arith.addf %62, %76 : vector<8x11xf32>
    %c4_i32 = arith.constant 4 : i32
    %cst_39 = arith.constant dense<0.000000e+00> : vector<8x32xf32>
    %78 = tpu.matmul %77, %0, %cst_39 {dimension_numbers = #tpu.dot_dimension_numbers<[1], [0], [0], [1], [0, 0, 1, 1], [], []>} : vector<8x11xf32>, vector<11x32xf32>, vector<8x32xf32> -> vector<8x32xf32>
    %79 = arith.addf %78, %16 : vector<8x32xf32>
    %80 = math.tanh %79 : vector<8x32xf32>
    %cst_40 = arith.constant dense<0.000000e+00> : vector<8x32xf32>
    %81 = tpu.matmul %80, %1, %cst_40 {dimension_numbers = #tpu.dot_dimension_numbers<[1], [0], [0], [1], [0, 0, 1, 1], [], []>} : vector<8x32xf32>, vector<32x32xf32>, vector<8x32xf32> -> vector<8x32xf32>
    %82 = vector.broadcast %2 : vector<1x32xf32> to vector<8x32xf32>
    %83 = arith.addf %81, %82 : vector<8x32xf32>
    %84 = math.tanh %83 : vector<8x32xf32>
    %cst_41 = arith.constant dense<0.000000e+00> : vector<8x32xf32>
    %85 = tpu.matmul %84, %3, %cst_41 {dimension_numbers = #tpu.dot_dimension_numbers<[1], [0], [0], [1], [0, 0, 1, 1], [], []>} : vector<8x32xf32>, vector<32x32xf32>, vector<8x32xf32> -> vector<8x32xf32>
    %86 = vector.broadcast %4 : vector<1x32xf32> to vector<8x32xf32>
    %87 = arith.addf %85, %86 : vector<8x32xf32>
    %88 = math.tanh %87 : vector<8x32xf32>
    %cst_42 = arith.constant dense<0.000000e+00> : vector<8x11xf32>
    %89 = tpu.matmul %88, %7, %cst_42 {dimension_numbers = #tpu.dot_dimension_numbers<[1], [0], [0], [1], [0, 0, 1, 1], [], []>} : vector<8x32xf32>, vector<32x11xf32>, vector<8x11xf32> -> vector<8x11xf32>
    %90 = vector.broadcast %10 : vector<1x11xf32> to vector<8x11xf32>
    %91 = arith.addf %89, %90 : vector<8x11xf32>
    %92 = arith.addf %77, %91 : vector<8x11xf32>
    %c5_i32 = arith.constant 5 : i32
    %cst_43 = arith.constant dense<0.000000e+00> : vector<8x32xf32>
    %93 = tpu.matmul %92, %0, %cst_43 {dimension_numbers = #tpu.dot_dimension_numbers<[1], [0], [0], [1], [0, 0, 1, 1], [], []>} : vector<8x11xf32>, vector<11x32xf32>, vector<8x32xf32> -> vector<8x32xf32>
    %94 = arith.addf %93, %16 : vector<8x32xf32>
    %95 = math.tanh %94 : vector<8x32xf32>
    %cst_44 = arith.constant dense<0.000000e+00> : vector<8x32xf32>
    %96 = tpu.matmul %95, %1, %cst_44 {dimension_numbers = #tpu.dot_dimension_numbers<[1], [0], [0], [1], [0, 0, 1, 1], [], []>} : vector<8x32xf32>, vector<32x32xf32>, vector<8x32xf32> -> vector<8x32xf32>
    %97 = vector.broadcast %2 : vector<1x32xf32> to vector<8x32xf32>
    %98 = arith.addf %96, %97 : vector<8x32xf32>
    %99 = math.tanh %98 : vector<8x32xf32>
    %cst_45 = arith.constant dense<0.000000e+00> : vector<8x32xf32>
    %100 = tpu.matmul %99, %3, %cst_45 {dimension_numbers = #tpu.dot_dimension_numbers<[1], [0], [0], [1], [0, 0, 1, 1], [], []>} : vector<8x32xf32>, vector<32x32xf32>, vector<8x32xf32> -> vector<8x32xf32>
    %101 = vector.broadcast %4 : vector<1x32xf32> to vector<8x32xf32>
    %102 = arith.addf %100, %101 : vector<8x32xf32>
    %103 = math.tanh %102 : vector<8x32xf32>
    %cst_46 = arith.constant dense<0.000000e+00> : vector<8x11xf32>
    %104 = tpu.matmul %103, %7, %cst_46 {dimension_numbers = #tpu.dot_dimension_numbers<[1], [0], [0], [1], [0, 0, 1, 1], [], []>} : vector<8x32xf32>, vector<32x11xf32>, vector<8x11xf32> -> vector<8x11xf32>
    %105 = vector.broadcast %10 : vector<1x11xf32> to vector<8x11xf32>
    %106 = arith.addf %104, %105 : vector<8x11xf32>
    %107 = arith.addf %92, %106 : vector<8x11xf32>
    %c6_i32 = arith.constant 6 : i32
    %cst_47 = arith.constant dense<0.000000e+00> : vector<8x32xf32>
    %108 = tpu.matmul %107, %0, %cst_47 {dimension_numbers = #tpu.dot_dimension_numbers<[1], [0], [0], [1], [0, 0, 1, 1], [], []>} : vector<8x11xf32>, vector<11x32xf32>, vector<8x32xf32> -> vector<8x32xf32>
    %109 = arith.addf %108, %16 : vector<8x32xf32>
    %110 = math.tanh %109 : vector<8x32xf32>
    %cst_48 = arith.constant dense<0.000000e+00> : vector<8x32xf32>
    %111 = tpu.matmul %110, %1, %cst_48 {dimension_numbers = #tpu.dot_dimension_numbers<[1], [0], [0], [1], [0, 0, 1, 1], [], []>} : vector<8x32xf32>, vector<32x32xf32>, vector<8x32xf32> -> vector<8x32xf32>
    %112 = vector.broadcast %2 : vector<1x32xf32> to vector<8x32xf32>
    %113 = arith.addf %111, %112 : vector<8x32xf32>
    %114 = math.tanh %113 : vector<8x32xf32>
    %cst_49 = arith.constant dense<0.000000e+00> : vector<8x32xf32>
    %115 = tpu.matmul %114, %3, %cst_49 {dimension_numbers = #tpu.dot_dimension_numbers<[1], [0], [0], [1], [0, 0, 1, 1], [], []>} : vector<8x32xf32>, vector<32x32xf32>, vector<8x32xf32> -> vector<8x32xf32>
    %116 = vector.broadcast %4 : vector<1x32xf32> to vector<8x32xf32>
    %117 = arith.addf %115, %116 : vector<8x32xf32>
    %118 = math.tanh %117 : vector<8x32xf32>
    %cst_50 = arith.constant dense<0.000000e+00> : vector<8x11xf32>
    %119 = tpu.matmul %118, %7, %cst_50 {dimension_numbers = #tpu.dot_dimension_numbers<[1], [0], [0], [1], [0, 0, 1, 1], [], []>} : vector<8x32xf32>, vector<32x11xf32>, vector<8x11xf32> -> vector<8x11xf32>
    %120 = vector.broadcast %10 : vector<1x11xf32> to vector<8x11xf32>
    %121 = arith.addf %119, %120 : vector<8x11xf32>
    %122 = arith.addf %107, %121 : vector<8x11xf32>
    %c7_i32 = arith.constant 7 : i32
    %cst_51 = arith.constant dense<0.000000e+00> : vector<8x32xf32>
    %123 = tpu.matmul %122, %0, %cst_51 {dimension_numbers = #tpu.dot_dimension_numbers<[1], [0], [0], [1], [0, 0, 1, 1], [], []>} : vector<8x11xf32>, vector<11x32xf32>, vector<8x32xf32> -> vector<8x32xf32>
    %124 = arith.addf %123, %16 : vector<8x32xf32>
    %125 = math.tanh %124 : vector<8x32xf32>
    %cst_52 = arith.constant dense<0.000000e+00> : vector<8x32xf32>
    %126 = tpu.matmul %125, %1, %cst_52 {dimension_numbers = #tpu.dot_dimension_numbers<[1], [0], [0], [1], [0, 0, 1, 1], [], []>} : vector<8x32xf32>, vector<32x32xf32>, vector<8x32xf32> -> vector<8x32xf32>
    %127 = vector.broadcast %2 : vector<1x32xf32> to vector<8x32xf32>
    %128 = arith.addf %126, %127 : vector<8x32xf32>
    %129 = math.tanh %128 : vector<8x32xf32>
    %cst_53 = arith.constant dense<0.000000e+00> : vector<8x32xf32>
    %130 = tpu.matmul %129, %3, %cst_53 {dimension_numbers = #tpu.dot_dimension_numbers<[1], [0], [0], [1], [0, 0, 1, 1], [], []>} : vector<8x32xf32>, vector<32x32xf32>, vector<8x32xf32> -> vector<8x32xf32>
    %131 = vector.broadcast %4 : vector<1x32xf32> to vector<8x32xf32>
    %132 = arith.addf %130, %131 : vector<8x32xf32>
    %133 = math.tanh %132 : vector<8x32xf32>
    %cst_54 = arith.constant dense<0.000000e+00> : vector<8x11xf32>
    %134 = tpu.matmul %133, %7, %cst_54 {dimension_numbers = #tpu.dot_dimension_numbers<[1], [0], [0], [1], [0, 0, 1, 1], [], []>} : vector<8x32xf32>, vector<32x11xf32>, vector<8x11xf32> -> vector<8x11xf32>
    %135 = vector.broadcast %10 : vector<1x11xf32> to vector<8x11xf32>
    %136 = arith.addf %134, %135 : vector<8x11xf32>
    %137 = arith.addf %122, %136 : vector<8x11xf32>
    %c8_i32 = arith.constant 8 : i32
    %cst_55 = arith.constant dense<0.000000e+00> : vector<8x32xf32>
    %138 = tpu.matmul %137, %0, %cst_55 {dimension_numbers = #tpu.dot_dimension_numbers<[1], [0], [0], [1], [0, 0, 1, 1], [], []>} : vector<8x11xf32>, vector<11x32xf32>, vector<8x32xf32> -> vector<8x32xf32>
    %139 = arith.addf %138, %16 : vector<8x32xf32>
    %140 = math.tanh %139 : vector<8x32xf32>
    %cst_56 = arith.constant dense<0.000000e+00> : vector<8x32xf32>
    %141 = tpu.matmul %140, %1, %cst_56 {dimension_numbers = #tpu.dot_dimension_numbers<[1], [0], [0], [1], [0, 0, 1, 1], [], []>} : vector<8x32xf32>, vector<32x32xf32>, vector<8x32xf32> -> vector<8x32xf32>
    %142 = vector.broadcast %2 : vector<1x32xf32> to vector<8x32xf32>
    %143 = arith.addf %141, %142 : vector<8x32xf32>
    %144 = math.tanh %143 : vector<8x32xf32>
    %cst_57 = arith.constant dense<0.000000e+00> : vector<8x32xf32>
    %145 = tpu.matmul %144, %3, %cst_57 {dimension_numbers = #tpu.dot_dimension_numbers<[1], [0], [0], [1], [0, 0, 1, 1], [], []>} : vector<8x32xf32>, vector<32x32xf32>, vector<8x32xf32> -> vector<8x32xf32>
    %146 = vector.broadcast %4 : vector<1x32xf32> to vector<8x32xf32>
    %147 = arith.addf %145, %146 : vector<8x32xf32>
    %148 = math.tanh %147 : vector<8x32xf32>
    %cst_58 = arith.constant dense<0.000000e+00> : vector<8x11xf32>
    %149 = tpu.matmul %148, %7, %cst_58 {dimension_numbers = #tpu.dot_dimension_numbers<[1], [0], [0], [1], [0, 0, 1, 1], [], []>} : vector<8x32xf32>, vector<32x11xf32>, vector<8x11xf32> -> vector<8x11xf32>
    %150 = vector.broadcast %10 : vector<1x11xf32> to vector<8x11xf32>
    %151 = arith.addf %149, %150 : vector<8x11xf32>
    %152 = arith.addf %137, %151 : vector<8x11xf32>
    %c9_i32 = arith.constant 9 : i32
    %cst_59 = arith.constant dense<0.000000e+00> : vector<8x32xf32>
    %153 = tpu.matmul %152, %0, %cst_59 {dimension_numbers = #tpu.dot_dimension_numbers<[1], [0], [0], [1], [0, 0, 1, 1], [], []>} : vector<8x11xf32>, vector<11x32xf32>, vector<8x32xf32> -> vector<8x32xf32>
    %154 = arith.addf %153, %16 : vector<8x32xf32>
    %155 = math.tanh %154 : vector<8x32xf32>
    %cst_60 = arith.constant dense<0.000000e+00> : vector<8x32xf32>
    %156 = tpu.matmul %155, %1, %cst_60 {dimension_numbers = #tpu.dot_dimension_numbers<[1], [0], [0], [1], [0, 0, 1, 1], [], []>} : vector<8x32xf32>, vector<32x32xf32>, vector<8x32xf32> -> vector<8x32xf32>
    %157 = vector.broadcast %2 : vector<1x32xf32> to vector<8x32xf32>
    %158 = arith.addf %156, %157 : vector<8x32xf32>
    %159 = math.tanh %158 : vector<8x32xf32>
    %cst_61 = arith.constant dense<0.000000e+00> : vector<8x32xf32>
    %160 = tpu.matmul %159, %3, %cst_61 {dimension_numbers = #tpu.dot_dimension_numbers<[1], [0], [0], [1], [0, 0, 1, 1], [], []>} : vector<8x32xf32>, vector<32x32xf32>, vector<8x32xf32> -> vector<8x32xf32>
    %161 = vector.broadcast %4 : vector<1x32xf32> to vector<8x32xf32>
    %162 = arith.addf %160, %161 : vector<8x32xf32>
    %163 = math.tanh %162 : vector<8x32xf32>
    %cst_62 = arith.constant dense<0.000000e+00> : vector<8x11xf32>
    %164 = tpu.matmul %163, %7, %cst_62 {dimension_numbers = #tpu.dot_dimension_numbers<[1], [0], [0], [1], [0, 0, 1, 1], [], []>} : vector<8x32xf32>, vector<32x11xf32>, vector<8x11xf32> -> vector<8x11xf32>
    %165 = vector.broadcast %10 : vector<1x11xf32> to vector<8x11xf32>
    %166 = arith.addf %164, %165 : vector<8x11xf32>
    %167 = arith.addf %152, %166 : vector<8x11xf32>
    %c10_i32 = arith.constant 10 : i32
    %cst_63 = arith.constant dense<0.000000e+00> : vector<8x32xf32>
    %168 = tpu.matmul %167, %0, %cst_63 {dimension_numbers = #tpu.dot_dimension_numbers<[1], [0], [0], [1], [0, 0, 1, 1], [], []>} : vector<8x11xf32>, vector<11x32xf32>, vector<8x32xf32> -> vector<8x32xf32>
    %169 = arith.addf %168, %16 : vector<8x32xf32>
    %170 = math.tanh %169 : vector<8x32xf32>
    %cst_64 = arith.constant dense<0.000000e+00> : vector<8x32xf32>
    %171 = tpu.matmul %170, %1, %cst_64 {dimension_numbers = #tpu.dot_dimension_numbers<[1], [0], [0], [1], [0, 0, 1, 1], [], []>} : vector<8x32xf32>, vector<32x32xf32>, vector<8x32xf32> -> vector<8x32xf32>
    %172 = vector.broadcast %2 : vector<1x32xf32> to vector<8x32xf32>
    %173 = arith.addf %171, %172 : vector<8x32xf32>
    %174 = math.tanh %173 : vector<8x32xf32>
    %cst_65 = arith.constant dense<0.000000e+00> : vector<8x32xf32>
    %175 = tpu.matmul %174, %3, %cst_65 {dimension_numbers = #tpu.dot_dimension_numbers<[1], [0], [0], [1], [0, 0, 1, 1], [], []>} : vector<8x32xf32>, vector<32x32xf32>, vector<8x32xf32> -> vector<8x32xf32>
    %176 = vector.broadcast %4 : vector<1x32xf32> to vector<8x32xf32>
    %177 = arith.addf %175, %176 : vector<8x32xf32>
    %178 = math.tanh %177 : vector<8x32xf32>
    %cst_66 = arith.constant dense<0.000000e+00> : vector<8x11xf32>
    %179 = tpu.matmul %178, %7, %cst_66 {dimension_numbers = #tpu.dot_dimension_numbers<[1], [0], [0], [1], [0, 0, 1, 1], [], []>} : vector<8x32xf32>, vector<32x11xf32>, vector<8x11xf32> -> vector<8x11xf32>
    %180 = vector.broadcast %10 : vector<1x11xf32> to vector<8x11xf32>
    %181 = arith.addf %179, %180 : vector<8x11xf32>
    %182 = arith.addf %167, %181 : vector<8x11xf32>
    %c11_i32 = arith.constant 11 : i32
    %cst_67 = arith.constant dense<0.000000e+00> : vector<8x32xf32>
    %183 = tpu.matmul %182, %0, %cst_67 {dimension_numbers = #tpu.dot_dimension_numbers<[1], [0], [0], [1], [0, 0, 1, 1], [], []>} : vector<8x11xf32>, vector<11x32xf32>, vector<8x32xf32> -> vector<8x32xf32>
    %184 = arith.addf %183, %16 : vector<8x32xf32>
    %185 = math.tanh %184 : vector<8x32xf32>
    %cst_68 = arith.constant dense<0.000000e+00> : vector<8x32xf32>
    %186 = tpu.matmul %185, %1, %cst_68 {dimension_numbers = #tpu.dot_dimension_numbers<[1], [0], [0], [1], [0, 0, 1, 1], [], []>} : vector<8x32xf32>, vector<32x32xf32>, vector<8x32xf32> -> vector<8x32xf32>
    %187 = vector.broadcast %2 : vector<1x32xf32> to vector<8x32xf32>
    %188 = arith.addf %186, %187 : vector<8x32xf32>
    %189 = math.tanh %188 : vector<8x32xf32>
    %cst_69 = arith.constant dense<0.000000e+00> : vector<8x32xf32>
    %190 = tpu.matmul %189, %3, %cst_69 {dimension_numbers = #tpu.dot_dimension_numbers<[1], [0], [0], [1], [0, 0, 1, 1], [], []>} : vector<8x32xf32>, vector<32x32xf32>, vector<8x32xf32> -> vector<8x32xf32>
    %191 = vector.broadcast %4 : vector<1x32xf32> to vector<8x32xf32>
    %192 = arith.addf %190, %191 : vector<8x32xf32>
    %193 = math.tanh %192 : vector<8x32xf32>
    %cst_70 = arith.constant dense<0.000000e+00> : vector<8x11xf32>
    %194 = tpu.matmul %193, %7, %cst_70 {dimension_numbers = #tpu.dot_dimension_numbers<[1], [0], [0], [1], [0, 0, 1, 1], [], []>} : vector<8x32xf32>, vector<32x11xf32>, vector<8x11xf32> -> vector<8x11xf32>
    %195 = vector.broadcast %10 : vector<1x11xf32> to vector<8x11xf32>
    %196 = arith.addf %194, %195 : vector<8x11xf32>
    %197 = arith.addf %182, %196 : vector<8x11xf32>
    %c12_i32 = arith.constant 12 : i32
    %cst_71 = arith.constant dense<0.000000e+00> : vector<8x32xf32>
    %198 = tpu.matmul %197, %0, %cst_71 {dimension_numbers = #tpu.dot_dimension_numbers<[1], [0], [0], [1], [0, 0, 1, 1], [], []>} : vector<8x11xf32>, vector<11x32xf32>, vector<8x32xf32> -> vector<8x32xf32>
    %199 = arith.addf %198, %16 : vector<8x32xf32>
    %200 = math.tanh %199 : vector<8x32xf32>
    %cst_72 = arith.constant dense<0.000000e+00> : vector<8x32xf32>
    %201 = tpu.matmul %200, %1, %cst_72 {dimension_numbers = #tpu.dot_dimension_numbers<[1], [0], [0], [1], [0, 0, 1, 1], [], []>} : vector<8x32xf32>, vector<32x32xf32>, vector<8x32xf32> -> vector<8x32xf32>
    %202 = vector.broadcast %2 : vector<1x32xf32> to vector<8x32xf32>
    %203 = arith.addf %201, %202 : vector<8x32xf32>
    %204 = math.tanh %203 : vector<8x32xf32>
    %cst_73 = arith.constant dense<0.000000e+00> : vector<8x32xf32>
    %205 = tpu.matmul %204, %3, %cst_73 {dimension_numbers = #tpu.dot_dimension_numbers<[1], [0], [0], [1], [0, 0, 1, 1], [], []>} : vector<8x32xf32>, vector<32x32xf32>, vector<8x32xf32> -> vector<8x32xf32>
    %206 = vector.broadcast %4 : vector<1x32xf32> to vector<8x32xf32>
    %207 = arith.addf %205, %206 : vector<8x32xf32>
    %208 = math.tanh %207 : vector<8x32xf32>
    %cst_74 = arith.constant dense<0.000000e+00> : vector<8x11xf32>
    %209 = tpu.matmul %208, %7, %cst_74 {dimension_numbers = #tpu.dot_dimension_numbers<[1], [0], [0], [1], [0, 0, 1, 1], [], []>} : vector<8x32xf32>, vector<32x11xf32>, vector<8x11xf32> -> vector<8x11xf32>
    %210 = vector.broadcast %10 : vector<1x11xf32> to vector<8x11xf32>
    %211 = arith.addf %209, %210 : vector<8x11xf32>
    %212 = arith.addf %197, %211 : vector<8x11xf32>
    %c13_i32 = arith.constant 13 : i32
    %cst_75 = arith.constant dense<0.000000e+00> : vector<8x32xf32>
    %213 = tpu.matmul %212, %0, %cst_75 {dimension_numbers = #tpu.dot_dimension_numbers<[1], [0], [0], [1], [0, 0, 1, 1], [], []>} : vector<8x11xf32>, vector<11x32xf32>, vector<8x32xf32> -> vector<8x32xf32>
    %214 = arith.addf %213, %16 : vector<8x32xf32>
    %215 = math.tanh %214 : vector<8x32xf32>
    %cst_76 = arith.constant dense<0.000000e+00> : vector<8x32xf32>
    %216 = tpu.matmul %215, %1, %cst_76 {dimension_numbers = #tpu.dot_dimension_numbers<[1], [0], [0], [1], [0, 0, 1, 1], [], []>} : vector<8x32xf32>, vector<32x32xf32>, vector<8x32xf32> -> vector<8x32xf32>
    %217 = vector.broadcast %2 : vector<1x32xf32> to vector<8x32xf32>
    %218 = arith.addf %216, %217 : vector<8x32xf32>
    %219 = math.tanh %218 : vector<8x32xf32>
    %cst_77 = arith.constant dense<0.000000e+00> : vector<8x32xf32>
    %220 = tpu.matmul %219, %3, %cst_77 {dimension_numbers = #tpu.dot_dimension_numbers<[1], [0], [0], [1], [0, 0, 1, 1], [], []>} : vector<8x32xf32>, vector<32x32xf32>, vector<8x32xf32> -> vector<8x32xf32>
    %221 = vector.broadcast %4 : vector<1x32xf32> to vector<8x32xf32>
    %222 = arith.addf %220, %221 : vector<8x32xf32>
    %223 = math.tanh %222 : vector<8x32xf32>
    %cst_78 = arith.constant dense<0.000000e+00> : vector<8x11xf32>
    %224 = tpu.matmul %223, %7, %cst_78 {dimension_numbers = #tpu.dot_dimension_numbers<[1], [0], [0], [1], [0, 0, 1, 1], [], []>} : vector<8x32xf32>, vector<32x11xf32>, vector<8x11xf32> -> vector<8x11xf32>
    %225 = vector.broadcast %10 : vector<1x11xf32> to vector<8x11xf32>
    %226 = arith.addf %224, %225 : vector<8x11xf32>
    %227 = arith.addf %212, %226 : vector<8x11xf32>
    %c14_i32 = arith.constant 14 : i32
    %cst_79 = arith.constant dense<0.000000e+00> : vector<8x32xf32>
    %228 = tpu.matmul %227, %0, %cst_79 {dimension_numbers = #tpu.dot_dimension_numbers<[1], [0], [0], [1], [0, 0, 1, 1], [], []>} : vector<8x11xf32>, vector<11x32xf32>, vector<8x32xf32> -> vector<8x32xf32>
    %229 = arith.addf %228, %16 : vector<8x32xf32>
    %230 = math.tanh %229 : vector<8x32xf32>
    %cst_80 = arith.constant dense<0.000000e+00> : vector<8x32xf32>
    %231 = tpu.matmul %230, %1, %cst_80 {dimension_numbers = #tpu.dot_dimension_numbers<[1], [0], [0], [1], [0, 0, 1, 1], [], []>} : vector<8x32xf32>, vector<32x32xf32>, vector<8x32xf32> -> vector<8x32xf32>
    %232 = vector.broadcast %2 : vector<1x32xf32> to vector<8x32xf32>
    %233 = arith.addf %231, %232 : vector<8x32xf32>
    %234 = math.tanh %233 : vector<8x32xf32>
    %cst_81 = arith.constant dense<0.000000e+00> : vector<8x32xf32>
    %235 = tpu.matmul %234, %3, %cst_81 {dimension_numbers = #tpu.dot_dimension_numbers<[1], [0], [0], [1], [0, 0, 1, 1], [], []>} : vector<8x32xf32>, vector<32x32xf32>, vector<8x32xf32> -> vector<8x32xf32>
    %236 = vector.broadcast %4 : vector<1x32xf32> to vector<8x32xf32>
    %237 = arith.addf %235, %236 : vector<8x32xf32>
    %238 = math.tanh %237 : vector<8x32xf32>
    %cst_82 = arith.constant dense<0.000000e+00> : vector<8x11xf32>
    %239 = tpu.matmul %238, %7, %cst_82 {dimension_numbers = #tpu.dot_dimension_numbers<[1], [0], [0], [1], [0, 0, 1, 1], [], []>} : vector<8x32xf32>, vector<32x11xf32>, vector<8x11xf32> -> vector<8x11xf32>
    %240 = vector.broadcast %10 : vector<1x11xf32> to vector<8x11xf32>
    %241 = arith.addf %239, %240 : vector<8x11xf32>
    %242 = arith.addf %227, %241 : vector<8x11xf32>
    %c15_i32 = arith.constant 15 : i32
    %cst_83 = arith.constant dense<0.000000e+00> : vector<8x32xf32>
    %243 = tpu.matmul %242, %0, %cst_83 {dimension_numbers = #tpu.dot_dimension_numbers<[1], [0], [0], [1], [0, 0, 1, 1], [], []>} : vector<8x11xf32>, vector<11x32xf32>, vector<8x32xf32> -> vector<8x32xf32>
    %244 = arith.addf %243, %16 : vector<8x32xf32>
    %245 = math.tanh %244 : vector<8x32xf32>
    %cst_84 = arith.constant dense<0.000000e+00> : vector<8x32xf32>
    %246 = tpu.matmul %245, %1, %cst_84 {dimension_numbers = #tpu.dot_dimension_numbers<[1], [0], [0], [1], [0, 0, 1, 1], [], []>} : vector<8x32xf32>, vector<32x32xf32>, vector<8x32xf32> -> vector<8x32xf32>
    %247 = vector.broadcast %2 : vector<1x32xf32> to vector<8x32xf32>
    %248 = arith.addf %246, %247 : vector<8x32xf32>
    %249 = math.tanh %248 : vector<8x32xf32>
    %cst_85 = arith.constant dense<0.000000e+00> : vector<8x32xf32>
    %250 = tpu.matmul %249, %3, %cst_85 {dimension_numbers = #tpu.dot_dimension_numbers<[1], [0], [0], [1], [0, 0, 1, 1], [], []>} : vector<8x32xf32>, vector<32x32xf32>, vector<8x32xf32> -> vector<8x32xf32>
    %251 = vector.broadcast %4 : vector<1x32xf32> to vector<8x32xf32>
    %252 = arith.addf %250, %251 : vector<8x32xf32>
    %253 = math.tanh %252 : vector<8x32xf32>
    %cst_86 = arith.constant dense<0.000000e+00> : vector<8x11xf32>
    %254 = tpu.matmul %253, %7, %cst_86 {dimension_numbers = #tpu.dot_dimension_numbers<[1], [0], [0], [1], [0, 0, 1, 1], [], []>} : vector<8x32xf32>, vector<32x11xf32>, vector<8x11xf32> -> vector<8x11xf32>
    %255 = vector.broadcast %10 : vector<1x11xf32> to vector<8x11xf32>
    %256 = arith.addf %254, %255 : vector<8x11xf32>
    %257 = arith.addf %242, %256 : vector<8x11xf32>
    %c0_87 = arith.constant 0 : index
    %c0_88 = arith.constant 0 : index
    %258 = vector.load %arg11[%c0_87, %c0_88] : memref<8x11xf32, #tpu.memory_space<vmem>>, vector<8x11xf32>
    tpu.vector_store %arg11[%c0_87, %c0_88], %257 {strides = array<i32>} : memref<8x11xf32, #tpu.memory_space<vmem>>, vector<8x11xf32>,
    return
  }
}

</mosaic_0001>

<bundles_post_ra>
// kernel: tpu_custom_call.1
= control target key start
LH: loop header
LB: loop body
LE: loop exit
PB: predicated region body
PF: predicated region fallthrough
CT: control target
= control target key end

     0   :  { %16 = vsyncpa [#allocation3], 0  ;;  %s2612_s0 = inlined_call_operand.hbm [shape: f32[8,11], index: 0, kind: input, shape index: {}]   ;;  %s2613_s1 = inlined_call_operand.vmem [shape: f32[8,3], index: 1, kind: input, shape index: {}]   ;;  %s2614_s2 = inlined_call_operand.vmem [shape: f32[11,32], index: 2, kind: input, shape index: {}]   ;;  %s2615_s3 = inlined_call_operand.vmem [shape: f32[3,32], index: 3, kind: input, shape index: {}]   ;;  %s2616_s4 = inlined_call_operand.hbm [shape: f32[1,32], index: 4, kind: input, shape index: {}]   ;;  %s2617_s5 = inlined_call_operand.vmem [shape: f32[32,32], index: 5, kind: input, shape index: {}]   ;;  %s2618_s6 = inlined_call_operand.hbm [shape: f32[1,32], index: 6, kind: input, shape index: {}]   ;;  %s2619_s7 = inlined_call_operand.hbm [shape: f32[32,32], index: 7, kind: input, shape index: {}]   ;;  %s2620_s8 = inlined_call_operand.hbm [shape: f32[1,32], index: 8, kind: input, shape index: {}]   ;;  %s2621_s9 = inlined_call_operand.vmem [shape: f32[32,11], index: 9, kind: input, shape index: {}]   ;;  %s2622_s10 = inlined_call_operand.vmem [shape: f32[1,11], index: 10, kind: input, shape index: {}]   ;;  %s2623_s11 = inlined_call_operand.hbm [shape: f32[8,11], index: 11, kind: output, shape index: {}]  }
   0x1   :  { %17 = vsyncpa [#allocation6], 0 }
   0x2   :  { %18 = vsyncpa [#allocation9], 0  ;;  %s42_s19 = sshll.u32 %s2616_s4, 4  ;;  %s43_s19 = int_to_ptr.hbm [resolvable:$true] %s42_s19 }
   0x3   :  { %19 = vsyncpa [#allocation4], 0  ;;  %s2077_s20 = smov [#allocation5]   ;;  %s65_s24 = sshll.u32 %s2619_s7, 4  ;;  %s66_s24 = int_to_ptr.hbm [resolvable:$true] %s65_s24 }
   0x4   :  { %s44_s21 = sshll.u32 %s2077_s20, 4  ;;  %s2078_s25 = smov [#allocation8]   ;;  %s45_s21 = int_to_ptr.vmem [resolvable:$true] %s44_s21 }
   0x5   :  { %47 = dma.hbm_to_vmem [thread:$0]  %s43_s19, 16, %s45_s21, [#allocation6]  }
   0x6   :  { %s67_s26 = sshll.u32 %s2078_s25, 4  ;;  %s2079_s27 = smov 128   ;;  %s68_s26 = int_to_ptr.vmem [resolvable:$true] %s67_s26 }
   0x7   :  { %s2080_s28 = smov 8   ;;  %s25_s4 = sshll.u32 %s2612_s0, 4  ;;  %s26_s4 = int_to_ptr.hbm [resolvable:$true] %s25_s4 }
   0x8   :  { %73 = dma.hbm_to_vmem [thread:$0]  %s66_s24, 512, %s68_s26, [#allocation9], %s2079_s27, %s2079_s27, %s2080_s28  }
   0x9   :  { %s2081_s12 = smov [#allocation2]   ;;  %s55_s7 = sshll.u32 %s2618_s6, 4  ;;  %s56_s7 = int_to_ptr.hbm [resolvable:$true] %s55_s7 }
   0xa   :  { %s27_s13 = sshll.u32 %s2081_s12, 4  ;;  %s2082_s16 = smov [#allocation7]   ;;  %s28_s13 = int_to_ptr.vmem [resolvable:$true] %s27_s13 }
   0xb   :  { %30 = dma.hbm_to_vmem [thread:$0]  %s26_s4, 128, %s28_s13, [#allocation3]  }
   0xc   :  { %s57_s17 = sshll.u32 %s2082_s16, 4  ;;  %s79_s20 = sshll.u32 %s2620_s8, 4  ;;  %s58_s17 = int_to_ptr.vmem [resolvable:$true] %s57_s17  ;;  %s80_s20 = int_to_ptr.hbm [resolvable:$true] %s79_s20 }
   0xd   :  { %60 = dma.hbm_to_vmem [thread:$0]  %s56_s7, 16, %s58_s17, [#allocation6]  }
   0xe   :  { %s2083_s0 = smov [#allocation10]  }
   0xf   :  { %s81_s21 = sshll.u32 %s2083_s0, 4  ;;  %s82_s21 = int_to_ptr.vmem [resolvable:$true] %s81_s21 }
  0x10   :  { %84 = dma.hbm_to_vmem [thread:$0]  %s80_s20, 16, %s82_s21, [#allocation9]  }
  0x11   :  { %2069 = dma.done.wait [#allocation3], 128  }
  0x12   :  { %2070 = vsyncadd [#allocation3], 4294967168 }
  0x13   :  { %2071 = dma.done.wait [#allocation6], 32  }
  0x14   :  { %2072 = vsyncadd [#allocation6], 4294967264 }
  0x15   :  { %2073 = dma.done.wait [#allocation9], 528  }
  0x16   :  { %2074 = vsyncadd [#allocation9], 4294966768  ;;  %vm141_vm0 = vcmask 1042432   ;;  %vm137_vm1 = vcmask 23552   ;;  %v132_v0 = vld [vmem:[%s2615_s3] sm:$0x7] }
  0x17   :  { %v2166_v1 = vld [vmem:[%s2614_s2 + $0x8] sm:$0x7]  ;;  %v131_v2 = vld [vmem:[%s2613_s1] sm:$0xff]  ;;  %1736 = vmatpush.msk.msra.mxu0 %vm141_vm0, %v132_v0  ;;  %vm166_vm2 = vcmask 89088   ;;  %v2193_v5 = vld [vmem:[%s2617_s5 + $0x18] sm:$0xff]  ;;  %vm197_vm3 = vcmask 261120  }
  0x18   :  { %1738 = vmatpush.msk.msra.mxu1 %vm141_vm0, %v2166_v1  ;;  %v2177_v3 = vld [vmem:[%s2614_s2] sm:$0xff]  ;;  %1737 = vmatmul.msk.f32.vlgmr.msra.gmra.mxu0 %vm137_vm1, %v131_v2  ;;  %v2199_v6 = vld [vmem:[%s2617_s5 + $0x10] sm:$0xff]  ;;  %v2204_v7 = vld [vmem:[%s2617_s5 + $0x8] sm:$0xff]  ;;  %s1724_s6 = sshll.u32 %s2623_s11, 4  ;;  %s1725_s6 = int_to_ptr.hbm [resolvable:$true] %s1724_s6 }
  0x19   :  { %v2179_v4 = vld [vmem:[#allocation2] sm:$0xff]  ;;  %213 = vmatpush.msra.mxu2 %v2193_v5  ;;  %v1826_v9 = vld [vmem:[#allocation5] ss:$0 sm:$0xff]  ;;  %v2231_v17 = vld [vmem:[#allocation8 + $0x8] sm:$0xff] }
  0x1a   :  { %188 = vmatpush.msra.mxu1 %v2177_v3  ;;  %v2210_v8 = vld [vmem:[%s2617_s5] sm:$0xff]  ;;  %v2234_v18 = vld [vmem:[#allocation8] sm:$0xff]  ;;  %v2242_v19 = vld [vmem:[#allocation7] ss:$0 sm:$0xff] }
  0x1b   :  { %1739 = vmatmul.msk.f32.vlgmr.msra.gmra.mxu1 %vm166_vm2, %v2179_v4  ;;  %214 = vmatpush.msra.mxu2 %v2199_v6  ;;  %v2226_v15 = vld [vmem:[#allocation8 + $0x18] sm:$0xff]  ;;  %v2229_v16 = vld [vmem:[#allocation8 + $0x10] sm:$0xff]  ;;  %v123_v25 = vld [vmem:[%s2621_s9 + $0x10] sm:$0xff] }
  0x1c   :  { %1743 = vmatpush.msk.msrb.mxu1 %vm141_vm0, %v2166_v1  ;;  %240 = vmatpush.msra.mxu3 %v2226_v15  ;;  %v124_v23 = vld [vmem:[%s2621_s9 + $0x18] sm:$0xff]  ;;  %v2259_v26 = vmul.f32 0.0625, %v123_v25  ;;  %v122_v27 = vld [vmem:[%s2621_s9 + $0x8] sm:$0xff]  ;;  %v121_v28 = vld [vmem:[%s2621_s9] sm:$0xff] }
  0x1d   :  { %215 = vmatpush.msra.mxu2 %v2204_v7  ;;  %v2253_v24 = vmul.f32 0.0625, %v124_v23  ;;  %v2267_v29 = vmul.f32 0.0625, %v122_v27  ;;  %v2270_v30 = vmul.f32 0.0625, %v121_v28  ;;  %v2278_v31 = vld [vmem:[#allocation10] ss:$0 sm:$0xff] }
  0x1e   :  { %294 = vmatpush.msrb.mxu1 %v2177_v3  ;;  %241 = vmatpush.msra.mxu3 %v2229_v16  ;;  %v129_v35 = vld [vmem:[%s2622_s10] sm:$0x1]  ;;  %s2084_s10 = smov [#allocation11]  }
  0x1f   :  { %216 = vmatpush.msra.mxu2 %v2210_v8  ;;  %267 = vmatpush.msrb.mxu0 %v2253_v24  ;;  %v130_v36 = vmul.f32 0.0625, %v129_v35  ;;  %s1722_s20 = sshll.u32 %s2084_s10, 4  ;;  %s1723_s20 = int_to_ptr.vmem [resolvable:$true] %s1722_s20 }
  0x20   :  { %1748 = vmatpush.msk.msra.mxu1 %vm141_vm0, %v2166_v1  ;;  %242 = vmatpush.msra.mxu3 %v2231_v17 }
  0x21   :  { %315 = vmatpush.msrb.mxu2 %v2193_v5  ;;  %268 = vmatpush.msrb.mxu0 %v2259_v26  ;;  %v2289_v37 = vperm.slane %v130_v36, 0 }
  0x22   :  { %390 = vmatpush.msra.mxu1 %v2177_v3  ;;  %243 = vmatpush.msra.mxu3 %v2234_v18 }
  0x23   :  { %316 = vmatpush.msrb.mxu2 %v2199_v6  ;;  %269 = vmatpush.msrb.mxu0 %v2267_v29 }
  0x24   :  { %339 = vmatpush.msrb.mxu3 %v2226_v15 }
  0x25   :  { %317 = vmatpush.msrb.mxu2 %v2204_v7  ;;  %270 = vmatpush.msrb.mxu0 %v2270_v30 }
  0x26   :  { %340 = vmatpush.msrb.mxu3 %v2229_v16 }
  0x27   :  { %318 = vmatpush.msrb.mxu2 %v2210_v8  ;;  %363 = vmatpush.msra.mxu0 %v2253_v24 }
  0x28   :  { %341 = vmatpush.msrb.mxu3 %v2231_v17 }
  0x29   :  { %364 = vmatpush.msra.mxu0 %v2259_v26 }
  0x2a   :  { %342 = vmatpush.msrb.mxu3 %v2234_v18 }
  0x2b   :  { %365 = vmatpush.msra.mxu0 %v2267_v29 }
  0x2d   :  { %366 = vmatpush.msra.mxu0 %v2270_v30 }
  0x95   :  { %v162_v10 = vpop.f32.mrf.mxu0 }
  0x96   :  { %v2218_v11 = vadd.f32 %v1826_v9, %v162_v10 }
  0x98   :  { %v190_v12 = vpop.f32.mrf.mxu1 }
  0x99   :  { %v191_v13 = vadd.f32 %v190_v12, %v2218_v11 }
  0x9b   :  { %1829 = vtanh.f32 %v191_v13 }
  0xa1   :  { %v1830_v14 = vpop.eup %1829 }
  0xa2   :  { %1740 = vmatmul.msk.f32.vlgmr.msra.gmra.mxu2 %vm197_vm3, %v1830_v14 }
  0xa3   :  { %411 = vmatpush.msra.mxu2 %v2193_v5 }
  0xa5   :  { %412 = vmatpush.msra.mxu2 %v2199_v6 }
  0xa7   :  { %413 = vmatpush.msra.mxu2 %v2204_v7 }
  0xa9   :  { %414 = vmatpush.msra.mxu2 %v2210_v8 }
 0x125   :  { %v218_v20 = vpop.f32.mrf.mxu2 }
 0x126   :  { %v219_v21 = vadd.f32 %v2242_v19, %v218_v20 }
 0x128   :  { %1831 = vtanh.f32 %v219_v21 }
 0x12e   :  { %v1832_v22 = vpop.eup %1831 }
 0x12f   :  { %1741 = vmatmul.msk.f32.vlgmr.msra.gmra.mxu3 %vm197_vm3, %v1832_v22 }
 0x130   :  { %435 = vmatpush.msra.mxu3 %v2226_v15 }
 0x132   :  { %436 = vmatpush.msra.mxu3 %v2229_v16 }
 0x134   :  { %437 = vmatpush.msra.mxu3 %v2231_v17 }
 0x136   :  { %438 = vmatpush.msra.mxu3 %v2234_v18 }
 0x1b2   :  { %v245_v32 = vpop.f32.mrf.mxu3 }
 0x1b3   :  { %v246_v33 = vadd.f32 %v2278_v31, %v245_v32 }
 0x1b5   :  { %1833 = vtanh.f32 %v246_v33 }
 0x1bb   :  { %v1834_v34 = vpop.eup %1833 }
 0x1bc   :  { %1742 = vmatmul.msk.f32.vlgmr.msrb.gmra.mxu0 %vm197_vm3, %v1834_v34 }
 0x1bd   :  { %459 = vmatpush.msrb.mxu0 %v2253_v24 }
 0x1bf   :  { %460 = vmatpush.msrb.mxu0 %v2259_v26 }
 0x1c1   :  { %461 = vmatpush.msrb.mxu0 %v2267_v29 }
 0x1c3   :  { %462 = vmatpush.msrb.mxu0 %v2270_v30 }
 0x239   :  { %v272_v38 = vpop.f32.mrf.mxu0 }
 0x23a   :  { %v273_v39 = vadd.f32 %v272_v38, %v2289_v37 }
 0x23c   :  { %v275_v40 = vadd.f32 %v273_v39, %v2179_v4 }
 0x23e   :  { %1744 = vmatmul.msk.f32.vlgmr.msrb.gmra.mxu1 %vm166_vm2, %v275_v40 }
 0x23f   :  { %1753 = vmatpush.msk.msrb.mxu1 %vm141_vm0, %v2166_v1 }
 0x241   :  { %486 = vmatpush.msrb.mxu1 %v2177_v3 }
 0x2bb   :  { %v296_v41 = vpop.f32.mrf.mxu1 }
 0x2bc   :  { %v297_v42 = vadd.f32 %v296_v41, %v2218_v11 }
 0x2be   :  { %1835 = vtanh.f32 %v297_v42 }
 0x2c4   :  { %v1836_v43 = vpop.eup %1835 }
 0x2c5   :  { %1745 = vmatmul.msk.f32.vlgmr.msrb.gmra.mxu2 %vm197_vm3, %v1836_v43 }
 0x2c6   :  { %507 = vmatpush.msrb.mxu2 %v2193_v5 }
 0x2c8   :  { %508 = vmatpush.msrb.mxu2 %v2199_v6 }
 0x2ca   :  { %509 = vmatpush.msrb.mxu2 %v2204_v7 }
 0x2cc   :  { %510 = vmatpush.msrb.mxu2 %v2210_v8 }
 0x348   :  { %v320_v44 = vpop.f32.mrf.mxu2 }
 0x349   :  { %v321_v45 = vadd.f32 %v2242_v19, %v320_v44 }
 0x34b   :  { %1837 = vtanh.f32 %v321_v45 }
 0x351   :  { %v1838_v46 = vpop.eup %1837 }
 0x352   :  { %1746 = vmatmul.msk.f32.vlgmr.msrb.gmra.mxu3 %vm197_vm3, %v1838_v46 }
 0x353   :  { %531 = vmatpush.msrb.mxu3 %v2226_v15 }
 0x355   :  { %532 = vmatpush.msrb.mxu3 %v2229_v16 }
 0x357   :  { %533 = vmatpush.msrb.mxu3 %v2231_v17 }
 0x359   :  { %534 = vmatpush.msrb.mxu3 %v2234_v18 }
 0x3d5   :  { %v344_v47 = vpop.f32.mrf.mxu3 }
 0x3d6   :  { %v345_v48 = vadd.f32 %v2278_v31, %v344_v47 }
 0x3d8   :  { %1839 = vtanh.f32 %v345_v48 }
 0x3de   :  { %v1840_v49 = vpop.eup %1839 }
 0x3df   :  { %1747 = vmatmul.msk.f32.vlgmr.msra.gmra.mxu0 %vm197_vm3, %v1840_v49 }
 0x3e0   :  { %555 = vmatpush.msra.mxu0 %v2253_v24 }
 0x3e2   :  { %556 = vmatpush.msra.mxu0 %v2259_v26 }
 0x3e4   :  { %557 = vmatpush.msra.mxu0 %v2267_v29 }
 0x3e6   :  { %558 = vmatpush.msra.mxu0 %v2270_v30 }
 0x45c   :  { %v368_v50 = vpop.f32.mrf.mxu0 }
 0x45d   :  { %v369_v51 = vadd.f32 %v368_v50, %v2289_v37 }
 0x45f   :  { %v371_v52 = vadd.f32 %v369_v51, %v275_v40 }
 0x461   :  { %1749 = vmatmul.msk.f32.vlgmr.msra.gmra.mxu1 %vm166_vm2, %v371_v52 }
 0x462   :  { %1758 = vmatpush.msk.msra.mxu1 %vm141_vm0, %v2166_v1 }
 0x464   :  { %582 = vmatpush.msra.mxu1 %v2177_v3 }
 0x4de   :  { %v392_v53 = vpop.f32.mrf.mxu1 }
 0x4df   :  { %v393_v54 = vadd.f32 %v392_v53, %v2218_v11 }
 0x4e1   :  { %1841 = vtanh.f32 %v393_v54 }
 0x4e7   :  { %v1842_v55 = vpop.eup %1841 }
 0x4e8   :  { %1750 = vmatmul.msk.f32.vlgmr.msra.gmra.mxu2 %vm197_vm3, %v1842_v55 }
 0x4e9   :  { %603 = vmatpush.msra.mxu2 %v2193_v5 }
 0x4eb   :  { %604 = vmatpush.msra.mxu2 %v2199_v6 }
 0x4ed   :  { %605 = vmatpush.msra.mxu2 %v2204_v7 }
 0x4ef   :  { %606 = vmatpush.msra.mxu2 %v2210_v8 }
 0x56b   :  { %v416_v56 = vpop.f32.mrf.mxu2 }
 0x56c   :  { %v417_v57 = vadd.f32 %v2242_v19, %v416_v56 }
 0x56e   :  { %1843 = vtanh.f32 %v417_v57 }
 0x574   :  { %v1844_v58 = vpop.eup %1843 }
 0x575   :  { %1751 = vmatmul.msk.f32.vlgmr.msra.gmra.mxu3 %vm197_vm3, %v1844_v58 }
 0x576   :  { %627 = vmatpush.msra.mxu3 %v2226_v15 }
 0x578   :  { %628 = vmatpush.msra.mxu3 %v2229_v16 }
 0x57a   :  { %629 = vmatpush.msra.mxu3 %v2231_v17 }
 0x57c   :  { %630 = vmatpush.msra.mxu3 %v2234_v18 }
 0x5f8   :  { %v440_v59 = vpop.f32.mrf.mxu3 }
 0x5f9   :  { %v441_v60 = vadd.f32 %v2278_v31, %v440_v59 }
 0x5fb   :  { %1845 = vtanh.f32 %v441_v60 }
 0x601   :  { %v1846_v61 = vpop.eup %1845 }
 0x602   :  { %1752 = vmatmul.msk.f32.vlgmr.msrb.gmra.mxu0 %vm197_vm3, %v1846_v61 }
 0x603   :  { %651 = vmatpush.msrb.mxu0 %v2253_v24 }
 0x605   :  { %652 = vmatpush.msrb.mxu0 %v2259_v26 }
 0x607   :  { %653 = vmatpush.msrb.mxu0 %v2267_v29 }
 0x609   :  { %654 = vmatpush.msrb.mxu0 %v2270_v30 }
 0x67f   :  { %v464_v62 = vpop.f32.mrf.mxu0 }
 0x680   :  { %v465_v63 = vadd.f32 %v464_v62, %v2289_v37 }
 0x682   :  { %v467_v0 = vadd.f32 %v465_v63, %v371_v52 }
 0x684   :  { %1754 = vmatmul.msk.f32.vlgmr.msrb.gmra.mxu1 %vm166_vm2, %v467_v0 }
 0x685   :  { %1763 = vmatpush.msk.msrb.mxu1 %vm141_vm0, %v2166_v1 }
 0x687   :  { %678 = vmatpush.msrb.mxu1 %v2177_v3 }
 0x701   :  { %v488_v2 = vpop.f32.mrf.mxu1 }
 0x702   :  { %v489_v4 = vadd.f32 %v488_v2, %v2218_v11 }
 0x704   :  { %1847 = vtanh.f32 %v489_v4 }
 0x70a   :  { %v1848_v9 = vpop.eup %1847 }
 0x70b   :  { %1755 = vmatmul.msk.f32.vlgmr.msrb.gmra.mxu2 %vm197_vm3, %v1848_v9 }
 0x70c   :  { %699 = vmatpush.msrb.mxu2 %v2193_v5 }
 0x70e   :  { %700 = vmatpush.msrb.mxu2 %v2199_v6 }
 0x710   :  { %701 = vmatpush.msrb.mxu2 %v2204_v7 }
 0x712   :  { %702 = vmatpush.msrb.mxu2 %v2210_v8 }
 0x78e   :  { %v512_v10 = vpop.f32.mrf.mxu2 }
 0x78f   :  { %v513_v12 = vadd.f32 %v2242_v19, %v512_v10 }
 0x791   :  { %1849 = vtanh.f32 %v513_v12 }
 0x797   :  { %v1850_v13 = vpop.eup %1849 }
 0x798   :  { %1756 = vmatmul.msk.f32.vlgmr.msrb.gmra.mxu3 %vm197_vm3, %v1850_v13 }
 0x799   :  { %723 = vmatpush.msrb.mxu3 %v2226_v15 }
 0x79b   :  { %724 = vmatpush.msrb.mxu3 %v2229_v16 }
 0x79d   :  { %725 = vmatpush.msrb.mxu3 %v2231_v17 }
 0x79f   :  { %726 = vmatpush.msrb.mxu3 %v2234_v18 }
 0x81b   :  { %v536_v14 = vpop.f32.mrf.mxu3 }
 0x81c   :  { %v537_v20 = vadd.f32 %v2278_v31, %v536_v14 }
 0x81e   :  { %1851 = vtanh.f32 %v537_v20 }
 0x824   :  { %v1852_v21 = vpop.eup %1851 }
 0x825   :  { %1757 = vmatmul.msk.f32.vlgmr.msra.gmra.mxu0 %vm197_vm3, %v1852_v21 }
 0x826   :  { %747 = vmatpush.msra.mxu0 %v2253_v24 }
 0x828   :  { %748 = vmatpush.msra.mxu0 %v2259_v26 }
 0x82a   :  { %749 = vmatpush.msra.mxu0 %v2267_v29 }
 0x82c   :  { %750 = vmatpush.msra.mxu0 %v2270_v30 }
 0x8a2   :  { %v560_v22 = vpop.f32.mrf.mxu0 }
 0x8a3   :  { %v561_v23 = vadd.f32 %v560_v22, %v2289_v37 }
 0x8a5   :  { %v563_v25 = vadd.f32 %v561_v23, %v467_v0 }
 0x8a7   :  { %1759 = vmatmul.msk.f32.vlgmr.msra.gmra.mxu1 %vm166_vm2, %v563_v25 }
 0x8a8   :  { %1768 = vmatpush.msk.msra.mxu1 %vm141_vm0, %v2166_v1 }
 0x8aa   :  { %774 = vmatpush.msra.mxu1 %v2177_v3 }
 0x924   :  { %v584_v27 = vpop.f32.mrf.mxu1 }
 0x925   :  { %v585_v28 = vadd.f32 %v584_v27, %v2218_v11 }
 0x927   :  { %1853 = vtanh.f32 %v585_v28 }
 0x92d   :  { %v1854_v32 = vpop.eup %1853 }
 0x92e   :  { %1760 = vmatmul.msk.f32.vlgmr.msra.gmra.mxu2 %vm197_vm3, %v1854_v32 }
 0x92f   :  { %795 = vmatpush.msra.mxu2 %v2193_v5 }
 0x931   :  { %796 = vmatpush.msra.mxu2 %v2199_v6 }
 0x933   :  { %797 = vmatpush.msra.mxu2 %v2204_v7 }
 0x935   :  { %798 = vmatpush.msra.mxu2 %v2210_v8 }
 0x9b1   :  { %v608_v33 = vpop.f32.mrf.mxu2 }
 0x9b2   :  { %v609_v34 = vadd.f32 %v2242_v19, %v608_v33 }
 0x9b4   :  { %1855 = vtanh.f32 %v609_v34 }
 0x9ba   :  { %v1856_v35 = vpop.eup %1855 }
 0x9bb   :  { %1761 = vmatmul.msk.f32.vlgmr.msra.gmra.mxu3 %vm197_vm3, %v1856_v35 }
 0x9bc   :  { %819 = vmatpush.msra.mxu3 %v2226_v15 }
 0x9be   :  { %820 = vmatpush.msra.mxu3 %v2229_v16 }
 0x9c0   :  { %821 = vmatpush.msra.mxu3 %v2231_v17 }
 0x9c2   :  { %822 = vmatpush.msra.mxu3 %v2234_v18 }
 0xa3e   :  { %v632_v36 = vpop.f32.mrf.mxu3 }
 0xa3f   :  { %v633_v38 = vadd.f32 %v2278_v31, %v632_v36 }
 0xa41   :  { %1857 = vtanh.f32 %v633_v38 }
 0xa47   :  { %v1858_v39 = vpop.eup %1857 }
 0xa48   :  { %1762 = vmatmul.msk.f32.vlgmr.msrb.gmra.mxu0 %vm197_vm3, %v1858_v39 }
 0xa49   :  { %843 = vmatpush.msrb.mxu0 %v2253_v24 }
 0xa4b   :  { %844 = vmatpush.msrb.mxu0 %v2259_v26 }
 0xa4d   :  { %845 = vmatpush.msrb.mxu0 %v2267_v29 }
 0xa4f   :  { %846 = vmatpush.msrb.mxu0 %v2270_v30 }
 0xac5   :  { %v656_v40 = vpop.f32.mrf.mxu0 }
 0xac6   :  { %v657_v41 = vadd.f32 %v656_v40, %v2289_v37 }
 0xac8   :  { %v659_v42 = vadd.f32 %v657_v41, %v563_v25 }
 0xaca   :  { %1764 = vmatmul.msk.f32.vlgmr.msrb.gmra.mxu1 %vm166_vm2, %v659_v42 }
 0xacb   :  { %1773 = vmatpush.msk.msrb.mxu1 %vm141_vm0, %v2166_v1 }
 0xacd   :  { %870 = vmatpush.msrb.mxu1 %v2177_v3 }
 0xb47   :  { %v680_v43 = vpop.f32.mrf.mxu1 }
 0xb48   :  { %v681_v44 = vadd.f32 %v680_v43, %v2218_v11 }
 0xb4a   :  { %1859 = vtanh.f32 %v681_v44 }
 0xb50   :  { %v1860_v45 = vpop.eup %1859 }
 0xb51   :  { %1765 = vmatmul.msk.f32.vlgmr.msrb.gmra.mxu2 %vm197_vm3, %v1860_v45 }
 0xb52   :  { %891 = vmatpush.msrb.mxu2 %v2193_v5 }
 0xb54   :  { %892 = vmatpush.msrb.mxu2 %v2199_v6 }
 0xb56   :  { %893 = vmatpush.msrb.mxu2 %v2204_v7 }
 0xb58   :  { %894 = vmatpush.msrb.mxu2 %v2210_v8 }
 0xbd4   :  { %v704_v46 = vpop.f32.mrf.mxu2 }
 0xbd5   :  { %v705_v47 = vadd.f32 %v2242_v19, %v704_v46 }
 0xbd7   :  { %1861 = vtanh.f32 %v705_v47 }
 0xbdd   :  { %v1862_v48 = vpop.eup %1861 }
 0xbde   :  { %1766 = vmatmul.msk.f32.vlgmr.msrb.gmra.mxu3 %vm197_vm3, %v1862_v48 }
 0xbdf   :  { %915 = vmatpush.msrb.mxu3 %v2226_v15 }
 0xbe1   :  { %916 = vmatpush.msrb.mxu3 %v2229_v16 }
 0xbe3   :  { %917 = vmatpush.msrb.mxu3 %v2231_v17 }
 0xbe5   :  { %918 = vmatpush.msrb.mxu3 %v2234_v18 }
 0xc61   :  { %v728_v49 = vpop.f32.mrf.mxu3 }
 0xc62   :  { %v729_v50 = vadd.f32 %v2278_v31, %v728_v49 }
 0xc64   :  { %1863 = vtanh.f32 %v729_v50 }
 0xc6a   :  { %v1864_v51 = vpop.eup %1863 }
 0xc6b   :  { %1767 = vmatmul.msk.f32.vlgmr.msra.gmra.mxu0 %vm197_vm3, %v1864_v51 }
 0xc6c   :  { %939 = vmatpush.msra.mxu0 %v2253_v24 }
 0xc6e   :  { %940 = vmatpush.msra.mxu0 %v2259_v26 }
 0xc70   :  { %941 = vmatpush.msra.mxu0 %v2267_v29 }
 0xc72   :  { %942 = vmatpush.msra.mxu0 %v2270_v30 }
 0xce8   :  { %v752_v52 = vpop.f32.mrf.mxu0 }
 0xce9   :  { %v753_v53 = vadd.f32 %v752_v52, %v2289_v37 }
 0xceb   :  { %v755_v54 = vadd.f32 %v753_v53, %v659_v42 }
 0xced   :  { %1769 = vmatmul.msk.f32.vlgmr.msra.gmra.mxu1 %vm166_vm2, %v755_v54 }
 0xcee   :  { %1778 = vmatpush.msk.msra.mxu1 %vm141_vm0, %v2166_v1 }
 0xcf0   :  { %966 = vmatpush.msra.mxu1 %v2177_v3 }
 0xd6a   :  { %v776_v55 = vpop.f32.mrf.mxu1 }
 0xd6b   :  { %v777_v56 = vadd.f32 %v776_v55, %v2218_v11 }
 0xd6d   :  { %1865 = vtanh.f32 %v777_v56 }
 0xd73   :  { %v1866_v57 = vpop.eup %1865 }
 0xd74   :  { %1770 = vmatmul.msk.f32.vlgmr.msra.gmra.mxu2 %vm197_vm3, %v1866_v57 }
 0xd75   :  { %987 = vmatpush.msra.mxu2 %v2193_v5 }
 0xd77   :  { %988 = vmatpush.msra.mxu2 %v2199_v6 }
 0xd79   :  { %989 = vmatpush.msra.mxu2 %v2204_v7 }
 0xd7b   :  { %990 = vmatpush.msra.mxu2 %v2210_v8 }
 0xdf7   :  { %v800_v58 = vpop.f32.mrf.mxu2 }
 0xdf8   :  { %v801_v59 = vadd.f32 %v2242_v19, %v800_v58 }
 0xdfa   :  { %1867 = vtanh.f32 %v801_v59 }
 0xe00   :  { %v1868_v60 = vpop.eup %1867 }
 0xe01   :  { %1771 = vmatmul.msk.f32.vlgmr.msra.gmra.mxu3 %vm197_vm3, %v1868_v60 }
 0xe02   :  { %1011 = vmatpush.msra.mxu3 %v2226_v15 }
 0xe04   :  { %1012 = vmatpush.msra.mxu3 %v2229_v16 }
 0xe06   :  { %1013 = vmatpush.msra.mxu3 %v2231_v17 }
 0xe08   :  { %1014 = vmatpush.msra.mxu3 %v2234_v18 }
 0xe84   :  { %v824_v61 = vpop.f32.mrf.mxu3 }
 0xe85   :  { %v825_v62 = vadd.f32 %v2278_v31, %v824_v61 }
 0xe87   :  { %1869 = vtanh.f32 %v825_v62 }
 0xe8d   :  { %v1870_v63 = vpop.eup %1869 }
 0xe8e   :  { %1772 = vmatmul.msk.f32.vlgmr.msrb.gmra.mxu0 %vm197_vm3, %v1870_v63 }
 0xe8f   :  { %1035 = vmatpush.msrb.mxu0 %v2253_v24 }
 0xe91   :  { %1036 = vmatpush.msrb.mxu0 %v2259_v26 }
 0xe93   :  { %1037 = vmatpush.msrb.mxu0 %v2267_v29 }
 0xe95   :  { %1038 = vmatpush.msrb.mxu0 %v2270_v30 }
 0xf0b   :  { %v848_v0 = vpop.f32.mrf.mxu0 }
 0xf0c   :  { %v849_v2 = vadd.f32 %v848_v0, %v2289_v37 }
 0xf0e   :  { %v851_v4 = vadd.f32 %v849_v2, %v755_v54 }
 0xf10   :  { %1774 = vmatmul.msk.f32.vlgmr.msrb.gmra.mxu1 %vm166_vm2, %v851_v4 }
 0xf11   :  { %1783 = vmatpush.msk.msrb.mxu1 %vm141_vm0, %v2166_v1 }
 0xf13   :  { %1062 = vmatpush.msrb.mxu1 %v2177_v3 }
 0xf8d   :  { %v872_v9 = vpop.f32.mrf.mxu1 }
 0xf8e   :  { %v873_v10 = vadd.f32 %v872_v9, %v2218_v11 }
 0xf90   :  { %1871 = vtanh.f32 %v873_v10 }
 0xf96   :  { %v1872_v12 = vpop.eup %1871 }
 0xf97   :  { %1775 = vmatmul.msk.f32.vlgmr.msrb.gmra.mxu2 %vm197_vm3, %v1872_v12 }
 0xf98   :  { %1083 = vmatpush.msrb.mxu2 %v2193_v5 }
 0xf9a   :  { %1084 = vmatpush.msrb.mxu2 %v2199_v6 }
 0xf9c   :  { %1085 = vmatpush.msrb.mxu2 %v2204_v7 }
 0xf9e   :  { %1086 = vmatpush.msrb.mxu2 %v2210_v8 }
0x101a   :  { %v896_v13 = vpop.f32.mrf.mxu2 }
0x101b   :  { %v897_v14 = vadd.f32 %v2242_v19, %v896_v13 }
0x101d   :  { %1873 = vtanh.f32 %v897_v14 }
0x1023   :  { %v1874_v20 = vpop.eup %1873 }
0x1024   :  { %1776 = vmatmul.msk.f32.vlgmr.msrb.gmra.mxu3 %vm197_vm3, %v1874_v20 }
0x1025   :  { %1107 = vmatpush.msrb.mxu3 %v2226_v15 }
0x1027   :  { %1108 = vmatpush.msrb.mxu3 %v2229_v16 }
0x1029   :  { %1109 = vmatpush.msrb.mxu3 %v2231_v17 }
0x102b   :  { %1110 = vmatpush.msrb.mxu3 %v2234_v18 }
0x10a7   :  { %v920_v21 = vpop.f32.mrf.mxu3 }
0x10a8   :  { %v921_v22 = vadd.f32 %v2278_v31, %v920_v21 }
0x10aa   :  { %1875 = vtanh.f32 %v921_v22 }
0x10b0   :  { %v1876_v23 = vpop.eup %1875 }
0x10b1   :  { %1777 = vmatmul.msk.f32.vlgmr.msra.gmra.mxu0 %vm197_vm3, %v1876_v23 }
0x10b2   :  { %1131 = vmatpush.msra.mxu0 %v2253_v24 }
0x10b4   :  { %1132 = vmatpush.msra.mxu0 %v2259_v26 }
0x10b6   :  { %1133 = vmatpush.msra.mxu0 %v2267_v29 }
0x10b8   :  { %1134 = vmatpush.msra.mxu0 %v2270_v30 }
0x112e   :  { %v944_v25 = vpop.f32.mrf.mxu0 }
0x112f   :  { %v945_v27 = vadd.f32 %v944_v25, %v2289_v37 }
0x1131   :  { %v947_v28 = vadd.f32 %v945_v27, %v851_v4 }
0x1133   :  { %1779 = vmatmul.msk.f32.vlgmr.msra.gmra.mxu1 %vm166_vm2, %v947_v28 }
0x1134   :  { %1788 = vmatpush.msk.msra.mxu1 %vm141_vm0, %v2166_v1 }
0x1136   :  { %1158 = vmatpush.msra.mxu1 %v2177_v3 }
0x11b0   :  { %v968_v32 = vpop.f32.mrf.mxu1 }
0x11b1   :  { %v969_v33 = vadd.f32 %v968_v32, %v2218_v11 }
0x11b3   :  { %1877 = vtanh.f32 %v969_v33 }
0x11b9   :  { %v1878_v34 = vpop.eup %1877 }
0x11ba   :  { %1780 = vmatmul.msk.f32.vlgmr.msra.gmra.mxu2 %vm197_vm3, %v1878_v34 }
0x11bb   :  { %1179 = vmatpush.msra.mxu2 %v2193_v5 }
0x11bd   :  { %1180 = vmatpush.msra.mxu2 %v2199_v6 }
0x11bf   :  { %1181 = vmatpush.msra.mxu2 %v2204_v7 }
0x11c1   :  { %1182 = vmatpush.msra.mxu2 %v2210_v8 }
0x123d   :  { %v992_v35 = vpop.f32.mrf.mxu2 }
0x123e   :  { %v993_v36 = vadd.f32 %v2242_v19, %v992_v35 }
0x1240   :  { %1879 = vtanh.f32 %v993_v36 }
0x1246   :  { %v1880_v38 = vpop.eup %1879 }
0x1247   :  { %1781 = vmatmul.msk.f32.vlgmr.msra.gmra.mxu3 %vm197_vm3, %v1880_v38 }
0x1248   :  { %1203 = vmatpush.msra.mxu3 %v2226_v15 }
0x124a   :  { %1204 = vmatpush.msra.mxu3 %v2229_v16 }
0x124c   :  { %1205 = vmatpush.msra.mxu3 %v2231_v17 }
0x124e   :  { %1206 = vmatpush.msra.mxu3 %v2234_v18 }
0x12ca   :  { %v1016_v39 = vpop.f32.mrf.mxu3 }
0x12cb   :  { %v1017_v40 = vadd.f32 %v2278_v31, %v1016_v39 }
0x12cd   :  { %1881 = vtanh.f32 %v1017_v40 }
0x12d3   :  { %v1882_v41 = vpop.eup %1881 }
0x12d4   :  { %1782 = vmatmul.msk.f32.vlgmr.msrb.gmra.mxu0 %vm197_vm3, %v1882_v41 }
0x12d5   :  { %1227 = vmatpush.msrb.mxu0 %v2253_v24 }
0x12d7   :  { %1228 = vmatpush.msrb.mxu0 %v2259_v26 }
0x12d9   :  { %1229 = vmatpush.msrb.mxu0 %v2267_v29 }
0x12db   :  { %1230 = vmatpush.msrb.mxu0 %v2270_v30 }
0x1351   :  { %v1040_v42 = vpop.f32.mrf.mxu0 }
0x1352   :  { %v1041_v43 = vadd.f32 %v1040_v42, %v2289_v37 }
0x1354   :  { %v1043_v44 = vadd.f32 %v1041_v43, %v947_v28 }
0x1356   :  { %1784 = vmatmul.msk.f32.vlgmr.msrb.gmra.mxu1 %vm166_vm2, %v1043_v44 }
0x1357   :  { %1793 = vmatpush.msk.msrb.mxu1 %vm141_vm0, %v2166_v1 }
0x1359   :  { %1254 = vmatpush.msrb.mxu1 %v2177_v3 }
0x13d3   :  { %v1064_v45 = vpop.f32.mrf.mxu1 }
0x13d4   :  { %v1065_v46 = vadd.f32 %v1064_v45, %v2218_v11 }
0x13d6   :  { %1883 = vtanh.f32 %v1065_v46 }
0x13dc   :  { %v1884_v47 = vpop.eup %1883 }
0x13dd   :  { %1785 = vmatmul.msk.f32.vlgmr.msrb.gmra.mxu2 %vm197_vm3, %v1884_v47 }
0x13de   :  { %1275 = vmatpush.msrb.mxu2 %v2193_v5 }
0x13e0   :  { %1276 = vmatpush.msrb.mxu2 %v2199_v6 }
0x13e2   :  { %1277 = vmatpush.msrb.mxu2 %v2204_v7 }
0x13e4   :  { %1278 = vmatpush.msrb.mxu2 %v2210_v8 }
0x1460   :  { %v1088_v48 = vpop.f32.mrf.mxu2 }
0x1461   :  { %v1089_v49 = vadd.f32 %v2242_v19, %v1088_v48 }
0x1463   :  { %1885 = vtanh.f32 %v1089_v49 }
0x1469   :  { %v1886_v50 = vpop.eup %1885 }
0x146a   :  { %1786 = vmatmul.msk.f32.vlgmr.msrb.gmra.mxu3 %vm197_vm3, %v1886_v50 }
0x146b   :  { %1299 = vmatpush.msrb.mxu3 %v2226_v15 }
0x146d   :  { %1300 = vmatpush.msrb.mxu3 %v2229_v16 }
0x146f   :  { %1301 = vmatpush.msrb.mxu3 %v2231_v17 }
0x1471   :  { %1302 = vmatpush.msrb.mxu3 %v2234_v18 }
0x14ed   :  { %v1112_v51 = vpop.f32.mrf.mxu3 }
0x14ee   :  { %v1113_v52 = vadd.f32 %v2278_v31, %v1112_v51 }
0x14f0   :  { %1887 = vtanh.f32 %v1113_v52 }
0x14f6   :  { %v1888_v53 = vpop.eup %1887 }
0x14f7   :  { %1787 = vmatmul.msk.f32.vlgmr.msra.gmra.mxu0 %vm197_vm3, %v1888_v53 }
0x14f8   :  { %1323 = vmatpush.msra.mxu0 %v2253_v24 }
0x14fa   :  { %1324 = vmatpush.msra.mxu0 %v2259_v26 }
0x14fc   :  { %1325 = vmatpush.msra.mxu0 %v2267_v29 }
0x14fe   :  { %1326 = vmatpush.msra.mxu0 %v2270_v30 }
0x1574   :  { %v1136_v54 = vpop.f32.mrf.mxu0 }
0x1575   :  { %v1137_v55 = vadd.f32 %v1136_v54, %v2289_v37 }
0x1577   :  { %v1139_v56 = vadd.f32 %v1137_v55, %v1043_v44 }
0x1579   :  { %1789 = vmatmul.msk.f32.vlgmr.msra.gmra.mxu1 %vm166_vm2, %v1139_v56 }
0x157a   :  { %1798 = vmatpush.msk.msra.mxu1 %vm141_vm0, %v2166_v1 }
0x157c   :  { %1350 = vmatpush.msra.mxu1 %v2177_v3 }
0x15f6   :  { %v1160_v57 = vpop.f32.mrf.mxu1 }
0x15f7   :  { %v1161_v58 = vadd.f32 %v1160_v57, %v2218_v11 }
0x15f9   :  { %1889 = vtanh.f32 %v1161_v58 }
0x15ff   :  { %v1890_v59 = vpop.eup %1889 }
0x1600   :  { %1790 = vmatmul.msk.f32.vlgmr.msra.gmra.mxu2 %vm197_vm3, %v1890_v59 }
0x1601   :  { %1371 = vmatpush.msra.mxu2 %v2193_v5 }
0x1603   :  { %1372 = vmatpush.msra.mxu2 %v2199_v6 }
0x1605   :  { %1373 = vmatpush.msra.mxu2 %v2204_v7 }
0x1607   :  { %1374 = vmatpush.msra.mxu2 %v2210_v8 }
0x1683   :  { %v1184_v60 = vpop.f32.mrf.mxu2 }
0x1684   :  { %v1185_v61 = vadd.f32 %v2242_v19, %v1184_v60 }
0x1686   :  { %1891 = vtanh.f32 %v1185_v61 }
0x168c   :  { %v1892_v62 = vpop.eup %1891 }
0x168d   :  { %1791 = vmatmul.msk.f32.vlgmr.msra.gmra.mxu3 %vm197_vm3, %v1892_v62 }
0x168e   :  { %1395 = vmatpush.msra.mxu3 %v2226_v15 }
0x1690   :  { %1396 = vmatpush.msra.mxu3 %v2229_v16 }
0x1692   :  { %1397 = vmatpush.msra.mxu3 %v2231_v17 }
0x1694   :  { %1398 = vmatpush.msra.mxu3 %v2234_v18 }
0x1710   :  { %v1208_v63 = vpop.f32.mrf.mxu3 }
0x1711   :  { %v1209_v0 = vadd.f32 %v2278_v31, %v1208_v63 }
0x1713   :  { %1893 = vtanh.f32 %v1209_v0 }
0x1719   :  { %v1894_v2 = vpop.eup %1893 }
0x171a   :  { %1792 = vmatmul.msk.f32.vlgmr.msrb.gmra.mxu0 %vm197_vm3, %v1894_v2 }
0x171b   :  { %1419 = vmatpush.msrb.mxu0 %v2253_v24 }
0x171d   :  { %1420 = vmatpush.msrb.mxu0 %v2259_v26 }
0x171f   :  { %1421 = vmatpush.msrb.mxu0 %v2267_v29 }
0x1721   :  { %1422 = vmatpush.msrb.mxu0 %v2270_v30 }
0x1797   :  { %v1232_v4 = vpop.f32.mrf.mxu0 }
0x1798   :  { %v1233_v9 = vadd.f32 %v1232_v4, %v2289_v37 }
0x179a   :  { %v1235_v10 = vadd.f32 %v1233_v9, %v1139_v56 }
0x179c   :  { %1794 = vmatmul.msk.f32.vlgmr.msrb.gmra.mxu1 %vm166_vm2, %v1235_v10 }
0x179d   :  { %1803 = vmatpush.msk.msrb.mxu1 %vm141_vm0, %v2166_v1 }
0x179f   :  { %1446 = vmatpush.msrb.mxu1 %v2177_v3 }
0x1819   :  { %v1256_v12 = vpop.f32.mrf.mxu1 }
0x181a   :  { %v1257_v13 = vadd.f32 %v1256_v12, %v2218_v11 }
0x181c   :  { %1895 = vtanh.f32 %v1257_v13 }
0x1822   :  { %v1896_v14 = vpop.eup %1895 }
0x1823   :  { %1795 = vmatmul.msk.f32.vlgmr.msrb.gmra.mxu2 %vm197_vm3, %v1896_v14 }
0x1824   :  { %1467 = vmatpush.msrb.mxu2 %v2193_v5 }
0x1826   :  { %1468 = vmatpush.msrb.mxu2 %v2199_v6 }
0x1828   :  { %1469 = vmatpush.msrb.mxu2 %v2204_v7 }
0x182a   :  { %1470 = vmatpush.msrb.mxu2 %v2210_v8 }
0x18a6   :  { %v1280_v20 = vpop.f32.mrf.mxu2 }
0x18a7   :  { %v1281_v21 = vadd.f32 %v2242_v19, %v1280_v20 }
0x18a9   :  { %1897 = vtanh.f32 %v1281_v21 }
0x18af   :  { %v1898_v22 = vpop.eup %1897 }
0x18b0   :  { %1796 = vmatmul.msk.f32.vlgmr.msrb.gmra.mxu3 %vm197_vm3, %v1898_v22 }
0x18b1   :  { %1491 = vmatpush.msrb.mxu3 %v2226_v15 }
0x18b3   :  { %1492 = vmatpush.msrb.mxu3 %v2229_v16 }
0x18b5   :  { %1493 = vmatpush.msrb.mxu3 %v2231_v17 }
0x18b7   :  { %1494 = vmatpush.msrb.mxu3 %v2234_v18 }
0x1933   :  { %v1304_v23 = vpop.f32.mrf.mxu3 }
0x1934   :  { %v1305_v25 = vadd.f32 %v2278_v31, %v1304_v23 }
0x1936   :  { %1899 = vtanh.f32 %v1305_v25 }
0x193c   :  { %v1900_v27 = vpop.eup %1899 }
0x193d   :  { %1797 = vmatmul.msk.f32.vlgmr.msra.gmra.mxu0 %vm197_vm3, %v1900_v27 }
0x193e   :  { %1515 = vmatpush.msra.mxu0 %v2253_v24 }
0x1940   :  { %1516 = vmatpush.msra.mxu0 %v2259_v26 }
0x1942   :  { %1517 = vmatpush.msra.mxu0 %v2267_v29 }
0x1944   :  { %1518 = vmatpush.msra.mxu0 %v2270_v30 }
0x19ba   :  { %v1328_v28 = vpop.f32.mrf.mxu0 }
0x19bb   :  { %v1329_v32 = vadd.f32 %v1328_v28, %v2289_v37 }
0x19bd   :  { %v1331_v33 = vadd.f32 %v1329_v32, %v1235_v10 }
0x19bf   :  { %1799 = vmatmul.msk.f32.vlgmr.msra.gmra.mxu1 %vm166_vm2, %v1331_v33 }
0x19c0   :  { %1808 = vmatpush.msk.msra.mxu1 %vm141_vm0, %v2166_v1 }
0x19c2   :  { %1542 = vmatpush.msra.mxu1 %v2177_v3 }
0x1a3c   :  { %v1352_v34 = vpop.f32.mrf.mxu1 }
0x1a3d   :  { %v1353_v35 = vadd.f32 %v1352_v34, %v2218_v11 }
0x1a3f   :  { %1901 = vtanh.f32 %v1353_v35 }
0x1a45   :  { %v1902_v36 = vpop.eup %1901 }
0x1a46   :  { %1800 = vmatmul.msk.f32.vlgmr.msra.gmra.mxu2 %vm197_vm3, %v1902_v36 }
0x1a47   :  { %1563 = vmatpush.msra.mxu2 %v2193_v5 }
0x1a49   :  { %1564 = vmatpush.msra.mxu2 %v2199_v6 }
0x1a4b   :  { %1565 = vmatpush.msra.mxu2 %v2204_v7 }
0x1a4d   :  { %1566 = vmatpush.msra.mxu2 %v2210_v8 }
0x1ac9   :  { %v1376_v38 = vpop.f32.mrf.mxu2 }
0x1aca   :  { %v1377_v39 = vadd.f32 %v2242_v19, %v1376_v38 }
0x1acc   :  { %1903 = vtanh.f32 %v1377_v39 }
0x1ad2   :  { %v1904_v40 = vpop.eup %1903 }
0x1ad3   :  { %1801 = vmatmul.msk.f32.vlgmr.msra.gmra.mxu3 %vm197_vm3, %v1904_v40 }
0x1ad4   :  { %1587 = vmatpush.msra.mxu3 %v2226_v15 }
0x1ad6   :  { %1588 = vmatpush.msra.mxu3 %v2229_v16 }
0x1ad8   :  { %1589 = vmatpush.msra.mxu3 %v2231_v17 }
0x1ada   :  { %1590 = vmatpush.msra.mxu3 %v2234_v18 }
0x1b56   :  { %v1400_v41 = vpop.f32.mrf.mxu3 }
0x1b57   :  { %v1401_v42 = vadd.f32 %v2278_v31, %v1400_v41 }
0x1b59   :  { %1905 = vtanh.f32 %v1401_v42 }
0x1b5f   :  { %v1906_v43 = vpop.eup %1905 }
0x1b60   :  { %1802 = vmatmul.msk.f32.vlgmr.msrb.gmra.mxu0 %vm197_vm3, %v1906_v43 }
0x1b61   :  { %1611 = vmatpush.msrb.mxu0 %v2253_v24 }
0x1b63   :  { %1612 = vmatpush.msrb.mxu0 %v2259_v26 }
0x1b65   :  { %1613 = vmatpush.msrb.mxu0 %v2267_v29 }
0x1b67   :  { %1614 = vmatpush.msrb.mxu0 %v2270_v30 }
0x1bdd   :  { %v1424_v44 = vpop.f32.mrf.mxu0 }
0x1bde   :  { %v1425_v45 = vadd.f32 %v1424_v44, %v2289_v37 }
0x1be0   :  { %v1427_v46 = vadd.f32 %v1425_v45, %v1331_v33 }
0x1be2   :  { %1804 = vmatmul.msk.f32.vlgmr.msrb.gmra.mxu1 %vm166_vm2, %v1427_v46 }
0x1be3   :  { %1813 = vmatpush.msk.msrb.mxu1 %vm141_vm0, %v2166_v1 }
0x1be5   :  { %1638 = vmatpush.msrb.mxu1 %v2177_v3 }
0x1c5f   :  { %v1448_v47 = vpop.f32.mrf.mxu1 }
0x1c60   :  { %v1449_v48 = vadd.f32 %v1448_v47, %v2218_v11 }
0x1c62   :  { %1907 = vtanh.f32 %v1449_v48 }
0x1c68   :  { %v1908_v49 = vpop.eup %1907 }
0x1c69   :  { %1805 = vmatmul.msk.f32.vlgmr.msrb.gmra.mxu2 %vm197_vm3, %v1908_v49 }
0x1c6a   :  { %1659 = vmatpush.msrb.mxu2 %v2193_v5 }
0x1c6c   :  { %1660 = vmatpush.msrb.mxu2 %v2199_v6 }
0x1c6e   :  { %1661 = vmatpush.msrb.mxu2 %v2204_v7 }
0x1c70   :  { %1662 = vmatpush.msrb.mxu2 %v2210_v8 }
0x1cec   :  { %v1472_v50 = vpop.f32.mrf.mxu2 }
0x1ced   :  { %v1473_v1 = vadd.f32 %v2242_v19, %v1472_v50 }
0x1cef   :  { %1909 = vtanh.f32 %v1473_v1 }
0x1cf5   :  { %v1910_v3 = vpop.eup %1909 }
0x1cf6   :  { %1806 = vmatmul.msk.f32.vlgmr.msrb.gmra.mxu3 %vm197_vm3, %v1910_v3 }
0x1cf7   :  { %1683 = vmatpush.msrb.mxu3 %v2226_v15 }
0x1cf9   :  { %1684 = vmatpush.msrb.mxu3 %v2229_v16 }
0x1cfb   :  { %1685 = vmatpush.msrb.mxu3 %v2231_v17 }
0x1cfd   :  { %1686 = vmatpush.msrb.mxu3 %v2234_v18 }
0x1d79   :  { %v1496_v5 = vpop.f32.mrf.mxu3 }
0x1d7a   :  { %v1497_v6 = vadd.f32 %v2278_v31, %v1496_v5 }
0x1d7c   :  { %1911 = vtanh.f32 %v1497_v6 }
0x1d82   :  { %v1912_v7 = vpop.eup %1911 }
0x1d83   :  { %1807 = vmatmul.msk.f32.vlgmr.msra.gmra.mxu0 %vm197_vm3, %v1912_v7 }
0x1d84   :  { %1707 = vmatpush.msra.mxu0 %v2253_v24 }
0x1d86   :  { %1708 = vmatpush.msra.mxu0 %v2259_v26 }
0x1d88   :  { %1709 = vmatpush.msra.mxu0 %v2267_v29 }
0x1d8a   :  { %1710 = vmatpush.msra.mxu0 %v2270_v30 }
0x1e00   :  { %v1520_v8 = vpop.f32.mrf.mxu0 }
0x1e01   :  { %v1521_v15 = vadd.f32 %v1520_v8, %v2289_v37 }
0x1e03   :  { %v1523_v16 = vadd.f32 %v1521_v15, %v1427_v46 }
0x1e05   :  { %1809 = vmatmul.msk.f32.vlgmr.msra.gmra.mxu1 %vm166_vm2, %v1523_v16 }
0x1e82   :  { %v1544_v17 = vpop.f32.mrf.mxu1 }
0x1e83   :  { %v1545_v18 = vadd.f32 %v1544_v17, %v2218_v11 }
0x1e85   :  { %1913 = vtanh.f32 %v1545_v18 }
0x1e8b   :  { %v1914_v51 = vpop.eup %1913 }
0x1e8c   :  { %1810 = vmatmul.msk.f32.vlgmr.msra.gmra.mxu2 %vm197_vm3, %v1914_v51 }
0x1f0f   :  { %v1568_v24 = vpop.f32.mrf.mxu2 }
0x1f10   :  { %v1569_v26 = vadd.f32 %v2242_v19, %v1568_v24 }
0x1f12   :  { %1915 = vtanh.f32 %v1569_v26 }
0x1f18   :  { %v1916_v29 = vpop.eup %1915 }
0x1f19   :  { %1811 = vmatmul.msk.f32.vlgmr.msra.gmra.mxu3 %vm197_vm3, %v1916_v29 }
0x1f9c   :  { %v1592_v30 = vpop.f32.mrf.mxu3 }
0x1f9d   :  { %v1593_v52 = vadd.f32 %v2278_v31, %v1592_v30 }
0x1f9f   :  { %1917 = vtanh.f32 %v1593_v52 }
0x1fa5   :  { %v1918_v53 = vpop.eup %1917 }
0x1fa6   :  { %1812 = vmatmul.msk.f32.vlgmr.msrb.gmra.mxu0 %vm197_vm3, %v1918_v53 }
0x2023   :  { %v1616_v54 = vpop.f32.mrf.mxu0 }
0x2024   :  { %v1617_v55 = vadd.f32 %v1616_v54, %v2289_v37 }
0x2026   :  { %v1619_v56 = vadd.f32 %v1617_v55, %v1523_v16 }
0x2028   :  { %1814 = vmatmul.msk.f32.vlgmr.msrb.gmra.mxu1 %vm166_vm2, %v1619_v56 }
0x20a5   :  { %v1640_v57 = vpop.f32.mrf.mxu1 }
0x20a6   :  { %v1641_v58 = vadd.f32 %v1640_v57, %v2218_v11 }
0x20a8   :  { %1919 = vtanh.f32 %v1641_v58 }
0x20ae   :  { %v1920_v59 = vpop.eup %1919 }
0x20af   :  { %1815 = vmatmul.msk.f32.vlgmr.msrb.gmra.mxu2 %vm197_vm3, %v1920_v59 }
0x2132   :  { %v1664_v60 = vpop.f32.mrf.mxu2 }
0x2133   :  { %v1665_v61 = vadd.f32 %v2242_v19, %v1664_v60 }
0x2135   :  { %1921 = vtanh.f32 %v1665_v61 }
0x213b   :  { %v1922_v62 = vpop.eup %1921 }
0x213c   :  { %1816 = vmatmul.msk.f32.vlgmr.msrb.gmra.mxu3 %vm197_vm3, %v1922_v62 }
0x21bf   :  { %v1688_v63 = vpop.f32.mrf.mxu3 }
0x21c0   :  { %v1689_v0 = vadd.f32 %v2278_v31, %v1688_v63 }
0x21c2   :  { %1923 = vtanh.f32 %v1689_v0 }
0x21c8   :  { %v1924_v2 = vpop.eup %1923 }
0x21c9   :  { %1817 = vmatmul.msk.f32.vlgmr.msra.gmra.mxu0 %vm197_vm3, %v1924_v2 }
0x2246   :  { %v1712_v4 = vpop.f32.mrf.mxu0 }
0x2247   :  { %v1713_v11 = vadd.f32 %v1712_v4, %v2289_v37 }
0x2249   :  { %v1715_v19 = vadd.f32 %v1713_v11, %v1619_v56 }
0x224b   :  { %1716 = vst.msk [vmem:[#allocation11] sm:$0xff] %vm166_vm2, %v1715_v19 }
0x224c   :  { %1727 = dma.vmem_to_hbm [thread:$0]  %s1723_s20, 128, %s1725_s6, [#allocation4]  }
0x224d   :  { %2075 = dma.done.wait [#allocation4], 128  }
0x224e   :  { %2076 = vsyncadd [#allocation4], 4294967168 }
0x224f   :  { %1732 = vsyncpa [#allocation3], 1 }
0x2250   :  { %1733 = vsyncpa [#allocation6], 1 }
0x2251   :  { %1734 = vsyncpa [#allocation9], 1 }
0x2252   :  { %1735 = vsyncpa [#allocation4], 1 }

</bundles_post_ra>
